<compile_context>
chip_gen: v7x
topology: tpu7x:2x2x1
jax: 0.10.0
libtpu: 0.0.40
codegen_flags: <defaults>
</compile_context>

<pallas_src>
import functools

import jax
import jax.numpy as jnp
from jax.experimental import pallas as pl
from jax.experimental.pallas import tpu as pltpu


def _round_up(x, m):
    return (x + m - 1) // m * m


def classifier_kernel(ids_ref, t_ref, valid_ref, b1_ref, w2_ref, b2_ref,
                      o_ref, *, num_class):
    # ids_ref:   (TB, L)   int32 token ids (0 == padding)
    # t_ref:     (VP, HP)  folded table  emb @ W1, zero-padded
    # valid_ref: (1,  VP)  1.0 where emb_table[v].sum() != 0 else 0.0
    # b1_ref:    (1,  HP)  bias1 (zero-padded)
    # w2_ref:    (HP, CP)  W2 (zero-padded)
    # b2_ref:    (1,  CP)  bias2 (zero-padded)
    # o_ref:     (TB, CP)  lane-dense log-prob output (first C lanes valid)
    ids = ids_ref[...]
    tb, seq_len = ids.shape
    vp = t_ref.shape[0]

    # One-hot token counts over the (padded) vocab: cnt[b, v] = #{l: ids[b,l]==v}.
    # Accumulate in int32, convert to f32 once at the end.
    vocab_iota = jax.lax.broadcasted_iota(jnp.int32, (tb, vp), 1)
    cnt_i = jnp.zeros((tb, vp), jnp.int32)
    for l in range(seq_len):  # L is small and static -> unrolled at trace time
        cnt_i = cnt_i + (vocab_iota == ids[:, l:l + 1]).astype(jnp.int32)
    cnt = cnt_i.astype(jnp.float32)

    # Non-pad token count, exactly matching the reference mask
    # (mask = embedding-row-sum != 0); guard all-pad rows against div-by-zero.
    counts = jnp.sum(cnt * valid_ref[...], axis=1, keepdims=True)   # (TB, 1)
    counts = jnp.maximum(counts, 1.0)
    inv_counts = pl.reciprocal(counts, approx=False)

    # Gather+sum in hidden space on the MXU:  sum_L (emb @ W1)[ids]  ==  cnt @ T.
    hsum = jnp.dot(cnt, t_ref[...],
                   preferred_element_type=jnp.float32,
                   precision=jax.lax.Precision.HIGHEST)             # (TB, HP)

    # ff1: masked mean pool folded in via * 1/counts, then bias + ReLU.
    h1 = jnp.maximum(hsum * inv_counts + b1_ref[...], 0.0)

    # ff2: Dropout is identity at inference.
    # TODO(synk): training-mode dropout mask not implemented.
    h2 = jnp.dot(h1, w2_ref[...],
                 preferred_element_type=jnp.float32,
                 precision=jax.lax.Precision.HIGHEST) + b2_ref[...]  # (TB, CP)

    # log_softmax over the real class lanes; padded lanes masked to ~-inf.
    cls_iota = jax.lax.broadcasted_iota(jnp.int32, h2.shape, 1)
    h2 = jnp.where(cls_iota < num_class, h2, -1e30)
    m = jnp.max(h2, axis=1, keepdims=True)
    s = h2 - m
    lse = jnp.log(jnp.sum(jnp.exp(s), axis=1, keepdims=True))
    o_ref[...] = s - lse


def model_forward(x_tokens, emb_table, w1, b1, w2, b2, *, block_b=256):
    """x_tokens: (B, L) int token ids; returns (B, num_class) float32 log-probs."""
    B, L = x_tokens.shape
    V, _ = emb_table.shape
    H = w1.shape[1]
    C = w2.shape[1]

    VP = _round_up(V, 128)
    HP = _round_up(H, 128)
    CP = _round_up(C, 128)

    # One-time (HBM) preprocessing: fold embedding into W1 and pad lane-dense.
    T = jnp.dot(emb_table, w1, precision=jax.lax.Precision.HIGHEST)     # (V, H)
    T = jnp.zeros((VP, HP), jnp.float32).at[:V, :H].set(T)
    valid = jnp.zeros((1, VP), jnp.float32).at[0, :V].set(
        (jnp.sum(emb_table, axis=-1) != 0).astype(jnp.float32))
    b1p = jnp.zeros((1, HP), jnp.float32).at[0, :H].set(b1)
    w2p = jnp.zeros((HP, CP), jnp.float32).at[:H, :C].set(w2)
    b2p = jnp.zeros((1, CP), jnp.float32).at[0, :C].set(b2)

    # Batch tiling: pad B to a multiple of the batch tile (pad rows = all-pad
    # tokens; they are sliced off below).
    TB = block_b if B >= block_b else _round_up(B, 8)
    BP = _round_up(B, TB)
    ids = jnp.zeros((BP, L), jnp.int32).at[:B].set(x_tokens.astype(jnp.int32))

    kernel = functools.partial(classifier_kernel, num_class=C)
    out = pl.pallas_call(
        kernel,
        out_shape=jax.ShapeDtypeStruct((BP, CP), jnp.float32),
        grid_spec=pltpu.PrefetchScalarGridSpec(
            num_scalar_prefetch=0,
            grid=(BP // TB,),
            in_specs=[
                pl.BlockSpec((TB, L), lambda i: (i, 0)),     # token ids
                pl.BlockSpec((VP, HP), lambda i: (0, 0)),    # folded table T
                pl.BlockSpec((1, VP), lambda i: (0, 0)),     # valid-token mask
                pl.BlockSpec((1, HP), lambda i: (0, 0)),     # b1
                pl.BlockSpec((HP, CP), lambda i: (0, 0)),    # W2
                pl.BlockSpec((1, CP), lambda i: (0, 0)),     # b2
            ],
            out_specs=pl.BlockSpec((TB, CP), lambda i: (i, 0)),
        ),
        compiler_params=pltpu.CompilerParams(
            dimension_semantics=("parallel",)),
    )(ids, T, valid, b1p, w2p, b2p)
    return out[:B, :C]


def reference_forward(x_tokens, emb_table, w1, b1, w2, b2):
    h0 = jnp.take(emb_table, x_tokens, axis=0)
    mask = jnp.sum(h0, axis=-1) != 0
    pooled = jnp.sum(h0, axis=-2) / jnp.sum(mask, axis=1, keepdims=True)
    h1 = jax.nn.relu(
        jnp.dot(pooled, w1, precision=jax.lax.Precision.HIGHEST) + b1)
    h2 = jnp.dot(h1, w2, precision=jax.lax.Precision.HIGHEST) + b2
    return jax.nn.log_softmax(h2, axis=1)


def _make_params(key, V, E, H, C):
    k_emb, k_w1, k_b1, k_w2, k_b2 = jax.random.split(key, 5)
    emb_table = 0.1 * jax.random.normal(k_emb, (V, E), dtype=jnp.float32)
    emb_table = emb_table.at[0].set(0.0)                  # padding_idx=0
    w1 = 0.1 * jax.random.normal(k_w1, (E, H), dtype=jnp.float32)
    b1 = 0.1 * jax.random.normal(k_b1, (H,), dtype=jnp.float32)
    w2 = 0.1 * jax.random.normal(k_w2, (W := (H, C))[0], dtype=jnp.float32) \
        if False else 0.1 * jax.random.normal(k_w2, (H, C), dtype=jnp.float32)
    b2 = 0.1 * jax.random.normal(k_b2, (C,), dtype=jnp.float32)
    return emb_table, w1, b1, w2, b2


if __name__ == "__main__":
    E, H = 16, 200       # embedding dim, hidden dim (fixed by the module)
    key = jax.random.PRNGKey(0)
    k_p1, k_x1, k_len1, k_p2, k_x2, k_len2 = jax.random.split(key, 6)

    # --- Small check: B=4, L=8, V=30, C=5 (single grid step) ---
    B, L, V, C = 4, 8, 30, 5
    emb_table, w1, b1, w2, b2 = _make_params(k_p1, V, E, H, C)
    x = jax.random.randint(k_x1, (B, L), 1, V, dtype=jnp.int32)
    lens = jax.random.randint(k_len1, (B, 1), 1, L + 1, dtype=jnp.int32)
    x = jnp.where(jnp.arange(L)[None, :] < lens, x, 0)   # trailing padding

    out = jax.block_until_ready(model_forward(x, emb_table, w1, b1, w2, b2))
    ref = reference_forward(x, emb_table, w1, b1, w2, b2)
    assert out.shape == (B, C)
    assert jnp.allclose(out, ref, atol=1e-5, rtol=1e-5)

    # --- Multi-tile check: B=300 (grid of 2 batch tiles, padded rows) ---
    B2, L2, V2, C2 = 300, 12, 97, 7
    emb2, w12, b12, w22, b22 = _make_params(k_p2, V2, E, H, C2)
    x2 = jax.random.randint(k_x2, (B2, L2), 1, V2, dtype=jnp.int32)
    lens2 = jax.random.randint(k_len2, (B2, 1), 1, L2 + 1, dtype=jnp.int32)
    x2 = jnp.where(jnp.arange(L2)[None, :] < lens2, x2, 0)

    out2 = jax.block_until_ready(model_forward(x2, emb2, w12, b12, w22, b22))
    ref2 = reference_forward(x2, emb2, w12, b12, w22, b22)
    assert out2.shape == (B2, C2)
    assert jnp.allclose(out2, ref2, atol=1e-5, rtol=1e-5)

    print("KERNEL_OK")
</pallas_src>

<mosaic_0001>
module attributes {stable_mosaic.version = 11 : i64} {
  func.func @classifier_kernel(%arg0: i32, %arg1: memref<8x8xi32, #tpu.memory_space<vmem>>, %arg2: memref<128x256xf32, #tpu.memory_space<vmem>>, %arg3: memref<1x128xf32, #tpu.memory_space<vmem>>, %arg4: memref<1x256xf32, #tpu.memory_space<vmem>>, %arg5: memref<256x128xf32, #tpu.memory_space<vmem>>, %arg6: memref<1x128xf32, #tpu.memory_space<vmem>>, %arg7: memref<8x128xf32, #tpu.memory_space<vmem>>) attributes {dimension_semantics = [#tpu.dimension_semantics<parallel>], iteration_bounds = array<i64: 1>, scalar_prefetch = 0 : i64, scratch_operands = 0 : i64, tpu.core_type = #tpu.core_type<tc>, window_params = [{transform_indices = @transform_0, window_bounds = array<i64: 8, 8>}, {pipeline_mode = #tpu.pipeline_mode<synchronous>, transform_indices = @transform_1, window_bounds = array<i64: 128, 256>}, {pipeline_mode = #tpu.pipeline_mode<synchronous>, transform_indices = @transform_2, window_bounds = array<i64: 1, 128>}, {pipeline_mode = #tpu.pipeline_mode<synchronous>, transform_indices = @transform_3, window_bounds = array<i64: 1, 256>}, {pipeline_mode = #tpu.pipeline_mode<synchronous>, transform_indices = @transform_4, window_bounds = array<i64: 256, 128>}, {pipeline_mode = #tpu.pipeline_mode<synchronous>, transform_indices = @transform_5, window_bounds = array<i64: 1, 128>}, {transform_indices = @transform_6, window_bounds = array<i64: 8, 128>}]} {
    %c0 = arith.constant 0 : index
    %c0_0 = arith.constant 0 : index
    %0 = vector.load %arg1[%c0, %c0_0] : memref<8x8xi32, #tpu.memory_space<vmem>>, vector<8x8xi32>
    %1 = tpu.iota {dimensions = array<i32: 1>} : vector<8x128xi32>
    %c0_i32 = arith.constant 0 : i32
    %2 = vector.broadcast %c0_i32 : i32 to vector<8x128xi32>
    %3 = vector.extract_strided_slice %0 {offsets = [0, 0], sizes = [8, 1], strides = [1, 1]} : vector<8x8xi32> to vector<8x1xi32>
    %4 = vector.broadcast %3 : vector<8x1xi32> to vector<8x128xi32>
    %5 = arith.cmpi eq, %1, %4 : vector<8x128xi32>
    %6 = arith.extui %5 : vector<8x128xi1> to vector<8x128xi32>
    %7 = arith.addi %2, %6 : vector<8x128xi32>
    %8 = vector.extract_strided_slice %0 {offsets = [0, 1], sizes = [8, 1], strides = [1, 1]} : vector<8x8xi32> to vector<8x1xi32>
    %9 = vector.broadcast %8 : vector<8x1xi32> to vector<8x128xi32>
    %10 = arith.cmpi eq, %1, %9 : vector<8x128xi32>
    %11 = arith.extui %10 : vector<8x128xi1> to vector<8x128xi32>
    %12 = arith.addi %7, %11 : vector<8x128xi32>
    %13 = vector.extract_strided_slice %0 {offsets = [0, 2], sizes = [8, 1], strides = [1, 1]} : vector<8x8xi32> to vector<8x1xi32>
    %14 = vector.broadcast %13 : vector<8x1xi32> to vector<8x128xi32>
    %15 = arith.cmpi eq, %1, %14 : vector<8x128xi32>
    %16 = arith.extui %15 : vector<8x128xi1> to vector<8x128xi32>
    %17 = arith.addi %12, %16 : vector<8x128xi32>
    %18 = vector.extract_strided_slice %0 {offsets = [0, 3], sizes = [8, 1], strides = [1, 1]} : vector<8x8xi32> to vector<8x1xi32>
    %19 = vector.broadcast %18 : vector<8x1xi32> to vector<8x128xi32>
    %20 = arith.cmpi eq, %1, %19 : vector<8x128xi32>
    %21 = arith.extui %20 : vector<8x128xi1> to vector<8x128xi32>
    %22 = arith.addi %17, %21 : vector<8x128xi32>
    %23 = vector.extract_strided_slice %0 {offsets = [0, 4], sizes = [8, 1], strides = [1, 1]} : vector<8x8xi32> to vector<8x1xi32>
    %24 = vector.broadcast %23 : vector<8x1xi32> to vector<8x128xi32>
    %25 = arith.cmpi eq, %1, %24 : vector<8x128xi32>
    %26 = arith.extui %25 : vector<8x128xi1> to vector<8x128xi32>
    %27 = arith.addi %22, %26 : vector<8x128xi32>
    %28 = vector.extract_strided_slice %0 {offsets = [0, 5], sizes = [8, 1], strides = [1, 1]} : vector<8x8xi32> to vector<8x1xi32>
    %29 = vector.broadcast %28 : vector<8x1xi32> to vector<8x128xi32>
    %30 = arith.cmpi eq, %1, %29 : vector<8x128xi32>
    %31 = arith.extui %30 : vector<8x128xi1> to vector<8x128xi32>
    %32 = arith.addi %27, %31 : vector<8x128xi32>
    %33 = vector.extract_strided_slice %0 {offsets = [0, 6], sizes = [8, 1], strides = [1, 1]} : vector<8x8xi32> to vector<8x1xi32>
    %34 = vector.broadcast %33 : vector<8x1xi32> to vector<8x128xi32>
    %35 = arith.cmpi eq, %1, %34 : vector<8x128xi32>
    %36 = arith.extui %35 : vector<8x128xi1> to vector<8x128xi32>
    %37 = arith.addi %32, %36 : vector<8x128xi32>
    %38 = vector.extract_strided_slice %0 {offsets = [0, 7], sizes = [8, 1], strides = [1, 1]} : vector<8x8xi32> to vector<8x1xi32>
    %39 = vector.broadcast %38 : vector<8x1xi32> to vector<8x128xi32>
    %40 = arith.cmpi eq, %1, %39 : vector<8x128xi32>
    %41 = arith.extui %40 : vector<8x128xi1> to vector<8x128xi32>
    %42 = arith.addi %37, %41 : vector<8x128xi32>
    %43 = arith.sitofp %42 : vector<8x128xi32> to vector<8x128xf32>
    %c0_1 = arith.constant 0 : index
    %c0_2 = arith.constant 0 : index
    %44 = vector.load %arg3[%c0_1, %c0_2] : memref<1x128xf32, #tpu.memory_space<vmem>>, vector<1x128xf32>
    %45 = vector.broadcast %44 : vector<1x128xf32> to vector<8x128xf32>
    %46 = arith.mulf %43, %45 : vector<8x128xf32>
    %cst = arith.constant dense<0.000000e+00> : vector<8xf32>
    %47 = vector.multi_reduction <add>, %46, %cst [1] : vector<8x128xf32> to vector<8xf32>
    %48 = vector.shape_cast %47 : vector<8xf32> to vector<8x1xf32>
    %cst_3 = arith.constant 1.000000e+00 : f32
    %49 = vector.broadcast %cst_3 : f32 to vector<8x1xf32>
    %50 = arith.maximumf %48, %49 : vector<8x1xf32>
    %51 = tpu.reciprocal %50 : vector<8x1xf32> -> vector<8x1xf32>
    %c0_4 = arith.constant 0 : index
    %c0_5 = arith.constant 0 : index
    %52 = vector.load %arg2[%c0_4, %c0_5] : memref<128x256xf32, #tpu.memory_space<vmem>>, vector<128x256xf32>
    %cst_6 = arith.constant dense<0.000000e+00> : vector<8x256xf32>
    %53 = tpu.matmul %43, %52, %cst_6 {dimension_numbers = #tpu.dot_dimension_numbers<[1], [0], [0], [1], [0, 0, 1, 1], [], []>, precision = #tpu.contract_precision<fp32>} : vector<8x128xf32>, vector<128x256xf32>, vector<8x256xf32> -> vector<8x256xf32>
    %54 = vector.broadcast %51 : vector<8x1xf32> to vector<8x256xf32>
    %55 = arith.mulf %53, %54 : vector<8x256xf32>
    %c0_7 = arith.constant 0 : index
    %c0_8 = arith.constant 0 : index
    %56 = vector.load %arg4[%c0_7, %c0_8] : memref<1x256xf32, #tpu.memory_space<vmem>>, vector<1x256xf32>
    %57 = vector.broadcast %56 : vector<1x256xf32> to vector<8x256xf32>
    %58 = arith.addf %55, %57 : vector<8x256xf32>
    %cst_9 = arith.constant 0.000000e+00 : f32
    %59 = vector.broadcast %cst_9 : f32 to vector<8x256xf32>
    %60 = arith.maximumf %58, %59 : vector<8x256xf32>
    %c0_10 = arith.constant 0 : index
    %c0_11 = arith.constant 0 : index
    %61 = vector.load %arg5[%c0_10, %c0_11] : memref<256x128xf32, #tpu.memory_space<vmem>>, vector<256x128xf32>
    %cst_12 = arith.constant dense<0.000000e+00> : vector<8x128xf32>
    %62 = tpu.matmul %60, %61, %cst_12 {dimension_numbers = #tpu.dot_dimension_numbers<[1], [0], [0], [1], [0, 0, 1, 1], [], []>, precision = #tpu.contract_precision<fp32>} : vector<8x256xf32>, vector<256x128xf32>, vector<8x128xf32> -> vector<8x128xf32>
    %c0_13 = arith.constant 0 : index
    %c0_14 = arith.constant 0 : index
    %63 = vector.load %arg6[%c0_13, %c0_14] : memref<1x128xf32, #tpu.memory_space<vmem>>, vector<1x128xf32>
    %64 = vector.broadcast %63 : vector<1x128xf32> to vector<8x128xf32>
    %65 = arith.addf %62, %64 : vector<8x128xf32>
    %66 = tpu.iota {dimensions = array<i32: 1>} : vector<8x128xi32>
    %c5_i32 = arith.constant 5 : i32
    %67 = vector.broadcast %c5_i32 : i32 to vector<8x128xi32>
    %68 = arith.cmpi slt, %66, %67 : vector<8x128xi32>
    %cst_15 = arith.constant -1.000000e+30 : f32
    %69 = vector.broadcast %cst_15 : f32 to vector<8x128xf32>
    %70 = arith.select %68, %65, %69 : vector<8x128xi1>, vector<8x128xf32>
    %cst_16 = arith.constant dense<0xFF800000> : vector<8xf32>
    %71 = vector.multi_reduction <maximumf>, %70, %cst_16 [1] : vector<8x128xf32> to vector<8xf32>
    %72 = vector.shape_cast %71 : vector<8xf32> to vector<8x1xf32>
    %73 = vector.broadcast %72 : vector<8x1xf32> to vector<8x128xf32>
    %74 = arith.subf %70, %73 : vector<8x128xf32>
    %75 = math.exp %74 : vector<8x128xf32>
    %cst_17 = arith.constant dense<0.000000e+00> : vector<8xf32>
    %76 = vector.multi_reduction <add>, %75, %cst_17 [1] : vector<8x128xf32> to vector<8xf32>
    %77 = vector.shape_cast %76 : vector<8xf32> to vector<8x1xf32>
    %78 = math.log %77 : vector<8x1xf32>
    %79 = vector.broadcast %78 : vector<8x1xf32> to vector<8x128xf32>
    %80 = arith.subf %74, %79 : vector<8x128xf32>
    %c0_18 = arith.constant 0 : index
    %c0_19 = arith.constant 0 : index
    %81 = vector.load %arg7[%c0_18, %c0_19] : memref<8x128xf32, #tpu.memory_space<vmem>>, vector<8x128xf32>
    tpu.vector_store %arg7[%c0_18, %c0_19], %80 {strides = array<i32>} : memref<8x128xf32, #tpu.memory_space<vmem>>, vector<8x128xf32>,
    return
  }
  func.func @transform_0(%arg0: i32) -> (i32, i32) {
    %c0_i32 = arith.constant 0 : i32
    %c0_i32_0 = arith.constant 0 : i32
    return %arg0, %c0_i32 : i32, i32
  }
  func.func @transform_1(%arg0: i32) -> (i32, i32) {
    %c0_i32 = arith.constant 0 : i32
    %c0_i32_0 = arith.constant 0 : i32
    %c0_i32_1 = arith.constant 0 : i32
    return %c0_i32, %c0_i32_0 : i32, i32
  }
  func.func @transform_2(%arg0: i32) -> (i32, i32) {
    %c0_i32 = arith.constant 0 : i32
    %c0_i32_0 = arith.constant 0 : i32
    %c0_i32_1 = arith.constant 0 : i32
    return %c0_i32, %c0_i32_0 : i32, i32
  }
  func.func @transform_3(%arg0: i32) -> (i32, i32) {
    %c0_i32 = arith.constant 0 : i32
    %c0_i32_0 = arith.constant 0 : i32
    %c0_i32_1 = arith.constant 0 : i32
    return %c0_i32, %c0_i32_0 : i32, i32
  }
  func.func @transform_4(%arg0: i32) -> (i32, i32) {
    %c0_i32 = arith.constant 0 : i32
    %c0_i32_0 = arith.constant 0 : i32
    %c0_i32_1 = arith.constant 0 : i32
    return %c0_i32, %c0_i32_0 : i32, i32
  }
  func.func @transform_5(%arg0: i32) -> (i32, i32) {
    %c0_i32 = arith.constant 0 : i32
    %c0_i32_0 = arith.constant 0 : i32
    %c0_i32_1 = arith.constant 0 : i32
    return %c0_i32, %c0_i32_0 : i32, i32
  }
  func.func @transform_6(%arg0: i32) -> (i32, i32) {
    %c0_i32 = arith.constant 0 : i32
    %c0_i32_0 = arith.constant 0 : i32
    return %arg0, %c0_i32 : i32, i32
  }
}

</mosaic_0001>

<bundles_post_ra>
// kernel: tpu_custom_call.1
= control target key start
LH: loop header
LB: loop body
LE: loop exit
PB: predicated region body
PF: predicated region fallthrough
CT: control target
= control target key end

     0   :  { %11 = vsyncpa [#allocation3], 0  ;;  %s3802_s0 = inlined_call_operand.hbm [shape: s32[8,8], index: 0, kind: input, shape index: {}]   ;;  %s3803_s1 = inlined_call_operand.hbm [shape: f32[128,256], index: 1, kind: input, shape index: {}]   ;;  %s3804_s2 = inlined_call_operand.vmem [shape: f32[1,128], index: 2, kind: input, shape index: {}]   ;;  %s3805_s3 = inlined_call_operand.vmem [shape: f32[1,256], index: 3, kind: input, shape index: {}]   ;;  %s3806_s4 = inlined_call_operand.hbm [shape: f32[256,128], index: 4, kind: input, shape index: {}]   ;;  %s3807_s5 = inlined_call_operand.vmem [shape: f32[1,128], index: 5, kind: input, shape index: {}]   ;;  %s3808_s6 = inlined_call_operand.hbm [shape: f32[8,128], index: 6, kind: output, shape index: {}]  }
   0x1   :  { %12 = vsyncpa [#allocation6], 0 }
   0x2   :  { %13 = vsyncpa [#allocation4], 0  ;;  %s2693_s21 = smov [#allocation5]   ;;  %s2599_s25 = scalar_lea.hbm %s3803_s1, 4096 }
   0x3   :  { %s29_s22 = sshll.u32 %s2693_s21, 4  ;;  %p2600_p0 = scmp.ne.s32.totalorder %s3803_s1, %s2599_s25  ;;  %s30_s22 = int_to_ptr.vmem [resolvable:$true] %s29_s22 }
   0x4   :  { %p2603_p1 = scmp.lt.u32.totalorder %s2599_s25, %s3803_s1 }
   0x6   :  { %p2605_p2 = pnand %p2603_p1, %p2600_p0 }
   0x8   :  { %2608 = shalt.err (!%p2605_p2)
}
   0x9   :  { %s2609_s30 = scalar_lea.vmem %s30_s22, 4096  ;;  %p2614_p4 = scmp.lt.s32.totalorder %s30_s22, %s30_s22 }
   0xa   :  { %p2610_p3 = scmp.ne.s32.totalorder %s30_s22, %s2609_s30  ;;  %p2615_p5 = scmp.lt.s32.totalorder %s2609_s30, %s2609_s30 }
   0xc   :  { %p2616_p6 = por %p2615_p5, %p2614_p4 }
   0xe   :  { %p2617_p7 = pnand %p2616_p6, %p2610_p3 }
  0x10   :  { %2620 = shalt.err (!%p2617_p7)
}
  0x11   :  { %s2694_s7 = smov 256   ;;  %s2695_s8 = smov 16  }
  0x12   :  { %35 = dma.hbm_to_vmem [thread:$0]  %s3803_s1, 4096, %s30_s22, [#allocation6], %s2694_s7, %s2694_s7, %s2695_s8  }
  0x13   :  { %s2696_s11 = smov [#allocation2]   ;;  %s2697_s13 = smov [#allocation7]  }
  0x14   :  { %s20_s12 = sshll.u32 %s2696_s11, 4  ;;  %s45_s14 = sshll.u32 %s2697_s13, 4  ;;  %s21_s12 = int_to_ptr.vmem [resolvable:$true] %s20_s12  ;;  %s46_s14 = int_to_ptr.vmem [resolvable:$true] %s45_s14 }
  0x15   :  { %s2621_s17 = scalar_lea.hbm %s3802_s0, 128 }
  0x16   :  { %p2622_p8 = scmp.ne.s32.totalorder %s3802_s0, %s2621_s17  ;;  %p2625_p9 = scmp.lt.u32.totalorder %s2621_s17, %s3802_s0 }
  0x18   :  { %p2627_p10 = pnand %p2625_p9, %p2622_p8 }
  0x1a   :  { %2630 = shalt.err (!%p2627_p10)
}
  0x1b   :  { %s2631_s1 = scalar_lea.vmem %s21_s12, 128  ;;  %p2636_p12 = scmp.lt.s32.totalorder %s21_s12, %s21_s12 }
  0x1c   :  { %p2632_p11 = scmp.ne.s32.totalorder %s21_s12, %s2631_s1  ;;  %p2637_p13 = scmp.lt.s32.totalorder %s2631_s1, %s2631_s1 }
  0x1e   :  { %p2638_p0 = por %p2637_p13, %p2636_p12 }
  0x20   :  { %p2639_p1 = pnand %p2638_p0, %p2632_p11 }
  0x22   :  { %2642 = shalt.err (!%p2639_p1)
}
  0x23   :  { %23 = dma.hbm_to_vmem [thread:$0]  %s3802_s0, 128, %s21_s12, [#allocation3]  }
  0x24   :  { %s2643_s26 = scalar_lea.hbm %s3806_s4, 4096 }
  0x25   :  { %p2644_p2 = scmp.ne.s32.totalorder %s3806_s4, %s2643_s26  ;;  %p2647_p3 = scmp.lt.u32.totalorder %s2643_s26, %s3806_s4 }
  0x27   :  { %p2649_p4 = pnand %p2647_p3, %p2644_p2 }
  0x29   :  { %2652 = shalt.err (!%p2649_p4)
}
  0x2a   :  { %s2653_s7 = scalar_lea.vmem %s46_s14, 4096  ;;  %p2658_p6 = scmp.lt.s32.totalorder %s46_s14, %s46_s14 }
  0x2b   :  { %p2654_p5 = scmp.ne.s32.totalorder %s46_s14, %s2653_s7  ;;  %p2659_p7 = scmp.lt.s32.totalorder %s2653_s7, %s2653_s7 }
  0x2d   :  { %p2660_p8 = por %p2659_p7, %p2658_p6 }
  0x2f   :  { %p2661_p9 = pnand %p2660_p8, %p2654_p5 }
  0x31   :  { %2664 = shalt.err (!%p2661_p9)
}
  0x32   :  { %s2698_s0 = smov 128   ;;  %s2699_s8 = smov 8  }
  0x33   :  { %51 = dma.hbm_to_vmem [thread:$0]  %s3806_s4, 4096, %s46_s14, [#allocation6], %s2698_s0, %s2698_s0, %s2699_s8  }
  0x34   :  { %2687 = dma.done.wait [#allocation3], 128  }
  0x35   :  { %2688 = vsyncadd [#allocation3], 4294967168 }
  0x36   :  { %2689 = dma.done.wait [#allocation6], 8192  }
  0x37   :  { %2690 = vsyncadd [#allocation6], 4294959104  ;;  %v2700_v0 = vmov 2   ;;  %v3809_v1 = vmov 0   ;;  %v2782_v2 = vld [vmem:[#allocation2] sm:$0xff]  ;;  %v2784_v3 = vld [vmem:[#allocation5 + $0x8] sm:$0xff] }
  0x38   :  { %2586 = vset.pattern.permute.xlu1 %v2700_v0  ;;  %2584 = vset.pattern.permute.xlu0 %v3809_v1  ;;  %v2786_v4 = vld [vmem:[#allocation5 + $0x18] sm:$0xff]  ;;  %v158_v5 = vand.u32 4294901760, %v2784_v3  ;;  %v126_v7 = vld [vmem:[#allocation5] sm:$0xff]  ;;  %v128_v8 = vld [vmem:[#allocation5 + $0x10] sm:$0xff]  ;;  %v2702_v20 = vmov 3   ;;  %v2703_v21 = vmov 1  }
  0x39   :  { %78 = vperm.xlu1 %2586, %v2782_v2   ;;  %67 = vperm.xlu0 %2584, %v2782_v2   ;;  %v162_v6 = vand.u32 4294901760, %v2786_v4  ;;  %v160_v9 = vand.u32 4294901760, %v126_v7  ;;  %v164_v10 = vand.u32 4294901760, %v128_v8  ;;  %v131_v12 = vld [vmem:[#allocation5 + $0x28] sm:$0xff]  ;;  %v133_v13 = vld [vmem:[#allocation5 + $0x38] sm:$0xff]  ;;  %v130_v18 = vld [vmem:[#allocation5 + $0x20] sm:$0xff] }
  0x3a   :  { %v166_v17 = vand.u32 4294901760, %v131_v12  ;;  %v132_v19 = vld [vmem:[#allocation5 + $0x30] sm:$0xff]  ;;  %v170_v22 = vand.u32 4294901760, %v133_v13  ;;  %v168_v23 = vand.u32 4294901760, %v130_v18  ;;  %v135_v26 = vld [vmem:[#allocation5 + $0x48] sm:$0xff]  ;;  %v137_v27 = vld [vmem:[#allocation5 + $0x58] sm:$0xff] }
  0x3b   :  { %v2796_v11 = vpack.c.bf16 %v162_v6, %v158_v5  ;;  %v2798_v14 = vpack.c.bf16 %v164_v10, %v160_v9  ;;  %v2800_v15 = vsub.f32 %v126_v7, %v160_v9  ;;  %v2802_v16 = vsub.f32 %v128_v8, %v164_v10  ;;  %v134_v31 = vld [vmem:[#allocation5 + $0x40] sm:$0xff]  ;;  %v136_v32 = vld [vmem:[#allocation5 + $0x50] sm:$0xff]  ;;  %v139_v42 = vld [vmem:[#allocation5 + $0x68] sm:$0xff] }
  0x3c   :  { %v172_v24 = vand.u32 4294901760, %v132_v19  ;;  %v2807_v25 = vpack.c.bf16 %v170_v22, %v166_v17  ;;  %v174_v29 = vand.u32 4294901760, %v135_v26  ;;  %v178_v30 = vand.u32 4294901760, %v137_v27  ;;  %v141_v43 = vld [vmem:[#allocation5 + $0x78] sm:$0xff]  ;;  %v138_v47 = vld [vmem:[#allocation5 + $0x60] sm:$0xff]  ;;  %v140_v48 = vld [vmem:[#allocation5 + $0x70] sm:$0xff] }
  0x3d   :  { %3958 = vst [vmem:[#allocation12_spill] sm:$0xff] %v2798_v14  ;;  %2587 = vset.pattern.permute.xlu1 %v2702_v20  ;;  %2585 = vset.pattern.permute.xlu0 %v2703_v21  ;;  %v176_v33 = vand.u32 4294901760, %v134_v31  ;;  %v180_v34 = vand.u32 4294901760, %v136_v32  ;;  %v2704_v35 = vmov 4   ;;  %v2705_v36 = vmov 5   ;;  %v143_v57 = vld [vmem:[#allocation5 + $0x88] sm:$0xff] }
  0x3e   :  { %84 = vperm.xlu1 %2587, %v2782_v2   ;;  %72 = vperm.xlu0 %2585, %v2782_v2   ;;  %3959 = vst [vmem:[#allocation13_spill] sm:$0xff] %v2807_v25  ;;  %v2810_v28 = vpack.c.bf16 %v172_v24, %v168_v23  ;;  %v2813_v37 = vsub.f32 %v131_v12, %v166_v17  ;;  %v182_v45 = vand.u32 4294901760, %v139_v42  ;;  %v186_v46 = vand.u32 4294901760, %v141_v43  ;;  %v145_v58 = vld [vmem:[#allocation5 + $0x98] sm:$0xff]  ;;  %v142_v63 = vld [vmem:[#allocation5 + $0x80] sm:$0xff]  ;;  %v144_v0 = vld [vmem:[#allocation5 + $0x90] sm:$0xff] }
  0x3f   :  { %2174 = vmatprep.subr.bf16.mxu0 %v2796_v11  ;;  %v2815_v38 = vsub.f32 %v133_v13, %v170_v22  ;;  %v2817_v39 = vsub.f32 %v130_v18, %v168_v23  ;;  %v2821_v40 = vsub.f32 %v132_v19, %v172_v24  ;;  %v2823_v41 = vpack.c.bf16 %v178_v30, %v174_v29  ;;  %v147_v20 = vld [vmem:[#allocation5 + $0xa8] sm:$0xff]  ;;  %v149_v21 = vld [vmem:[#allocation5 + $0xb8] sm:$0xff]  ;;  %v156_v1 = vld [vmem:[#allocation5 + $0xf0] sm:$0xff] }
  0x40   :  { %2176 = vmatpush1.bf16.msra.mxu0 %v2798_v14  ;;  %3960 = vst [vmem:[#allocation14_spill] sm:$0xff] %v2810_v28  ;;  %v2826_v44 = vpack.c.bf16 %v180_v34, %v176_v33  ;;  %v184_v49 = vand.u32 4294901760, %v138_v47  ;;  %v188_v50 = vand.u32 4294901760, %v140_v48  ;;  %v2829_v51 = vsub.f32 %v135_v26, %v174_v29  ;;  %v146_v26 = vld [vmem:[#allocation5 + $0xa0] sm:$0xff] }
  0x41   :  { %2178 = vmatprep.subr.bf16.mxu0 %v2807_v25  ;;  %3961 = vst [vmem:[#allocation15_spill] sm:$0xff] %v2823_v41  ;;  %v2831_v52 = vsub.f32 %v137_v27, %v178_v30  ;;  %v2833_v53 = vsub.f32 %v134_v31, %v176_v33  ;;  %v2835_v54 = vsub.f32 %v136_v32, %v180_v34  ;;  %v2706_v55 = vmov 6   ;;  %v148_v27 = vld [vmem:[#allocation5 + $0xb0] sm:$0xff]  ;;  %v151_v33 = vld [vmem:[#allocation5 + $0xc8] sm:$0xff]  ;;  %v153_v34 = vld [vmem:[#allocation5 + $0xd8] sm:$0xff] }
  0x42   :  { %2588 = vset.pattern.permute.xlu1 %v2704_v35  ;;  %2589 = vset.pattern.permute.xlu0 %v2705_v36  ;;  %3962 = vst [vmem:[#allocation16_spill] sm:$0xff] %v2826_v44  ;;  %v2837_v56 = vpack.c.bf16 %v186_v46, %v182_v45  ;;  %v2707_v59 = vmov 7   ;;  %v2841_v60 = vpack.c.bf16 %v188_v50, %v184_v49  ;;  %v190_v61 = vand.u32 4294901760, %v143_v57 }
  0x43   :  { %90 = vperm.xlu1 %2588, %v2782_v2   ;;  %96 = vperm.xlu0 %2589, %v2782_v2   ;;  %v194_v62 = vand.u32 4294901760, %v145_v58  ;;  %v192_v7 = vand.u32 4294901760, %v142_v63  ;;  %v196_v8 = vand.u32 4294901760, %v144_v0  ;;  %v2844_v9 = vsub.f32 %v139_v42, %v182_v45  ;;  %v152_v45 = vld [vmem:[#allocation5 + $0xd0] sm:$0xff] }
  0x44   :  { %2180 = vmatpush1.bf16.msra.mxu0 %v2810_v28  ;;  %3963 = vst [vmem:[#allocation17_spill] sm:$0xff] %v2837_v56  ;;  %3964 = vst [vmem:[#allocation18_spill] sm:$0xff] %v2841_v60  ;;  %v2846_v10 = vsub.f32 %v141_v43, %v186_v46  ;;  %v2848_v12 = vsub.f32 %v138_v47, %v184_v49  ;;  %v2850_v13 = vsub.f32 %v140_v48, %v188_v50  ;;  %v150_v43 = vld [vmem:[#allocation5 + $0xc0] sm:$0xff]  ;;  %v155_v48 = vld [vmem:[#allocation5 + $0xe8] sm:$0xff] }
  0x45   :  { %2182 = vmatprep.subr.bf16.mxu0 %v2823_v41  ;;  %v2852_v17 = vpack.c.bf16 %v194_v62, %v190_v61  ;;  %v2854_v18 = vsub.f32 %v143_v57, %v190_v61  ;;  %v2856_v19 = vsub.f32 %v145_v58, %v194_v62  ;;  %v2859_v22 = vpack.c.bf16 %v196_v8, %v192_v7  ;;  %v157_v49 = vld [vmem:[#allocation5 + $0xf8] sm:$0xff]  ;;  %v154_v62 = vld [vmem:[#allocation5 + $0xe0] sm:$0xff] }
  0x46   :  { %v198_v23 = vand.u32 4294901760, %v147_v20  ;;  %v202_v24 = vand.u32 4294901760, %v149_v21  ;;  %v200_v29 = vand.u32 4294901760, %v146_v26  ;;  %v204_v30 = vand.u32 4294901760, %v148_v27 }
  0x47   :  { %2590 = vset.pattern.permute.xlu1 %v2706_v55  ;;  %2592 = vset.pattern.permute.xlu0 %v2707_v59  ;;  %3965 = vst [vmem:[#allocation19_spill] sm:$0xff] %v2852_v17  ;;  %3966 = vst [vmem:[#allocation20_spill] sm:$0xff] %v2859_v22  ;;  %v2868_v32 = vsub.f32 %v2784_v3, %v158_v5  ;;  %v2873_v35 = vsub.f32 %v2786_v4, %v162_v6  ;;  %v206_v36 = vand.u32 4294901760, %v151_v33 }
  0x48   :  { %102 = vperm.xlu1 %2590, %v2782_v2   ;;  %2184 = vmatpush1.bf16.msra.mxu0 %v2826_v44  ;;  %v2863_v31 = vpack.c.bf16 %v202_v24, %v198_v23  ;;  %v210_v42 = vand.u32 4294901760, %v153_v34  ;;  %v208_v46 = vand.u32 4294901760, %v150_v43  ;;  %v212_v3 = vand.u32 4294901760, %v152_v45 }
  0x49   :  { %2186 = vmatprep.subr.bf16.mxu0 %v2837_v56  ;;  %v214_v4 = vand.u32 4294901760, %v155_v48  ;;  %v218_v6 = vand.u32 4294901760, %v157_v49  ;;  %v3822_v55 = vand.u32 4294901760, %v2873_v35  ;;  %v2886_v57 = vsub.f32 %v142_v63, %v192_v7 }
  0x4a   :  { %3967 = vst [vmem:[#allocation21_spill] sm:$0xff] %v2863_v31  ;;  %v2879_v5 = vpack.c.bf16 %v210_v42, %v206_v36  ;;  %v2881_v47 = vpack.c.bf16 %v212_v3, %v208_v46  ;;  %v2888_v58 = vsub.f32 %v144_v0, %v196_v8  ;;  %v2892_v61 = vsub.f32 %v149_v21, %v202_v24 }
  0x4b   :  { %v2901_v50 = vsub.f32 %v153_v34, %v210_v42  ;;  %v2903_v63 = vsub.f32 %v150_v43, %v208_v46  ;;  %v2905_v0 = vsub.f32 %v152_v45, %v212_v3  ;;  %v2907_v7 = vpack.c.bf16 %v218_v6, %v214_v4 }
  0x4c   :  { %2591 = vset.pattern.permute.xlu1 %v2707_v59  ;;  %2188 = vmatpush1.bf16.msra.mxu0 %v2841_v60  ;;  %3969 = vst [vmem:[#allocation23_spill] sm:$0xff] %v2879_v5  ;;  %3970 = vst [vmem:[#allocation24_spill] sm:$0xff] %v2881_v47  ;;  %v2890_v59 = vsub.f32 %v147_v20, %v198_v23  ;;  %v2909_v8 = vsub.f32 %v155_v48, %v214_v4  ;;  %v216_v21 = vand.u32 4294901760, %v154_v62  ;;  %v3827_v24 = vmov 0.0  }
  0x4d   :  { %108 = vperm.xlu1 %2591, %v2782_v2   ;;  %2190 = vmatprep.subr.bf16.mxu0 %v2852_v17  ;;  %v2876_v2 = vpack.c.bf16 %v204_v30, %v200_v29  ;;  %3971 = vst [vmem:[#allocation25_spill] sm:$0xff] %v2907_v7  ;;  %v2912_v20 = vsub.f32 %v157_v49, %v218_v6  ;;  %v220_v23 = vand.u32 4294901760, %v156_v1  ;;  %v3817_v43 = vand.u32 4294901760, %v2813_v37 }
  0x4e   :  { %254 = vmatprep.mubr.f32.mxu0 %v3827_v24  ;;  %v3821_v4 = vand.u32 4294901760, %v2817_v39  ;;  %v3824_v6 = vand.u32 4294901760, %v2821_v40  ;;  %v3858_v17 = vand.u32 4294901760, %v2903_v63 }
  0x4f   :  { %3968 = vst [vmem:[#allocation22_spill] sm:$0xff] %v2876_v2  ;;  %v2924_v34 = vpack.c.bf16 %v220_v23, %v216_v21  ;;  %v2928_v42 = vsub.f32 %v156_v1, %v220_v23  ;;  %v293_v49 = vsub.f32 %v2813_v37, %v3817_v43  ;;  %v3820_v1 = vand.u32 4294901760, %v2815_v38 }
  0x50   :  { %2192 = vmatpush1.bf16.msra.mxu0 %v2859_v22  ;;  %v2899_v22 = vsub.f32 %v151_v33, %v206_v36  ;;  %v3818_v33 = vand.u32 4294901760, %v2802_v16  ;;  %v2926_v36 = vsub.f32 %v154_v62, %v216_v21  ;;  %v299_v43 = vsub.f32 %v2817_v39, %v3821_v4 }
  0x51   :  { %2194 = vmatprep.subr.bf16.mxu0 %v2863_v31  ;;  %v2895_v31 = vsub.f32 %v146_v26, %v200_v29  ;;  %v3972_v26 = vand.u32 4294901760, %v2868_v32  ;;  %v281_v29 = vsub.f32 %v2873_v35, %v3822_v55  ;;  %3973 = vst [vmem:[#allocation26_spill] sm:$0xff] %v2924_v34  ;;  %v3829_v4 = vand.u32 4294901760, %v2835_v54 }
  0x52   :  { %v287_v48 = vsub.f32 %v2802_v16, %v3818_v33  ;;  %v311_v33 = vsub.f32 %v2821_v40, %v3824_v6  ;;  %v3866_v56 = vand.u32 4294901760, %v2926_v36 }
  0x53   :  { %v282_v46 = vand.u32 4294901760, %v281_v29  ;;  %v305_v29 = vsub.f32 %v2815_v38, %v3820_v1 }
  0x54   :  { %2196 = vmatpush1.bf16.msra.mxu0 %v2876_v2  ;;  %v2897_v2 = vsub.f32 %v148_v27, %v204_v30  ;;  %v269_v27 = vsub.f32 %v2868_v32, %v3972_v26  ;;  %v3819_v30 = vand.u32 4294901760, %v2800_v15  ;;  %v288_v23 = vand.u32 4294901760, %v287_v48 }
  0x55   :  { %2198 = vmatprep.subr.bf16.mxu0 %v2879_v5  ;;  %v3823_v26 = vand.u32 4294901760, %v2829_v51  ;;  %v306_v48 = vand.u32 4294901760, %v305_v29  ;;  %v312_v1 = vand.u32 4294901760, %v311_v33  ;;  %v335_v33 = vsub.f32 %v2835_v54, %v3829_v4 }
  0x56   :  { %v270_v45 = vand.u32 4294901760, %v269_v27  ;;  %v275_v3 = vsub.f32 %v2800_v15, %v3819_v30  ;;  %v294_v27 = vand.u32 4294901760, %v293_v49  ;;  %v300_v49 = vand.u32 4294901760, %v299_v43 }
  0x57   :  { %v3831_v43 = vand.u32 4294901760, %v2846_v10  ;;  %v336_v24 = vand.u32 4294901760, %v335_v33 }
  0x58   :  { %2200 = vmatpush1.bf16.msra.mxu0 %v2881_v47  ;;  %v2205_v62 = vpack.c.bf16 %v282_v46, %v270_v45  ;;  %v276_v21 = vand.u32 4294901760, %v275_v3  ;;  %v317_v45 = vsub.f32 %v2829_v51, %v3823_v26  ;;  %v3825_v46 = vand.u32 4294901760, %v2831_v52 }
  0x59   :  { %2202 = vmatprep.subr.bf16.mxu0 %v2907_v7  ;;  %v3826_v3 = vand.u32 4294901760, %v2833_v53  ;;  %v2969_v26 = vpack.c.bf16 %v306_v48, %v294_v27  ;;  %v2971_v6 = vpack.c.bf16 %v312_v1, %v300_v49  ;;  %v353_v1 = vsub.f32 %v2846_v10, %v3831_v43 }
  0x5a   :  { %v2954_v30 = vpack.c.bf16 %v288_v23, %v276_v21  ;;  %v318_v55 = vand.u32 4294901760, %v317_v45  ;;  %v3830_v23 = vand.u32 4294901760, %v2844_v9  ;;  %v3836_v27 = vand.u32 4294901760, %v2850_v13 }
  0x5b   :  { %v323_v21 = vsub.f32 %v2833_v53, %v3826_v3  ;;  %v3834_v3 = vand.u32 4294901760, %v2848_v12  ;;  %v3841_v43 = vand.u32 4294901760, %v2856_v19 }
  0x5c   :  { %2204 = vmatpush1.bf16.msra.mxu0 %v2924_v34  ;;  %v359_v33 = vsub.f32 %v2850_v13, %v3836_v27  ;;  %v3845_v27 = vand.u32 4294901760, %v2890_v59 }
  0x5d   :  { %2206 = vmatprep.subr.bf16.mxu0 %v2205_v62  ;;  %v329_v62 = vsub.f32 %v2831_v52, %v3825_v46  ;;  %v324_v45 = vand.u32 4294901760, %v323_v21  ;;  %v341_v46 = vsub.f32 %v2844_v9, %v3830_v23  ;;  %v3835_v21 = vand.u32 4294901760, %v2854_v18 }
  0x5e   :  { %v354_v23 = vand.u32 4294901760, %v353_v1 }
  0x5f   :  { %v330_v29 = vand.u32 4294901760, %v329_v62  ;;  %v342_v49 = vand.u32 4294901760, %v341_v46  ;;  %v347_v62 = vsub.f32 %v2848_v12, %v3834_v3  ;;  %v2991_v4 = vpack.c.bf16 %v336_v24, %v324_v45 }
  0x60   :  { %v3842_v46 = vand.u32 4294901760, %v2886_v57  ;;  %v360_v24 = vand.u32 4294901760, %v359_v33  ;;  %v377_v45 = vsub.f32 %v2856_v19, %v3841_v43  ;;  %v3850_v33 = vand.u32 4294901760, %v2895_v31 }
  0x61   :  { %v2985_v48 = vpack.c.bf16 %v330_v29, %v318_v55  ;;  %v348_v34 = vand.u32 4294901760, %v347_v62  ;;  %v365_v55 = vsub.f32 %v2854_v18, %v3835_v21  ;;  %v3846_v29 = vand.u32 4294901760, %v2888_v58 }
  0x62   :  { %v3002_v3 = vpack.c.bf16 %v354_v23, %v342_v49  ;;  %v371_v62 = vsub.f32 %v2886_v57, %v3842_v46  ;;  %v378_v23 = vand.u32 4294901760, %v377_v45  ;;  %v3849_v49 = vand.u32 4294901760, %v2892_v61 }
  0x63   :  { %v366_v1 = vand.u32 4294901760, %v365_v55  ;;  %v383_v21 = vsub.f32 %v2888_v58, %v3846_v29  ;;  %v3014_v7 = vpack.c.bf16 %v360_v24, %v348_v34  ;;  %v389_v55 = vsub.f32 %v2890_v59, %v3845_v27 }
  0x64   :  { %v372_v47 = vand.u32 4294901760, %v371_v62  ;;  %v3851_v46 = vand.u32 4294901760, %v2897_v2  ;;  %v401_v34 = vsub.f32 %v2892_v61, %v3849_v49  ;;  %v395_v24 = vsub.f32 %v2895_v31, %v3850_v33 }
  0x65   :  { %v384_v43 = vand.u32 4294901760, %v383_v21  ;;  %v3022_v5 = vpack.c.bf16 %v378_v23, %v366_v1  ;;  %v390_v62 = vand.u32 4294901760, %v389_v55  ;;  %v3852_v27 = vand.u32 4294901760, %v2899_v22 }
  0x66   :  { %v407_v21 = vsub.f32 %v2897_v2, %v3851_v46  ;;  %v402_v29 = vand.u32 4294901760, %v401_v34  ;;  %v396_v1 = vand.u32 4294901760, %v395_v24  ;;  %v3857_v23 = vand.u32 4294901760, %v2901_v50 }
  0x67   :  { %v3030_v45 = vpack.c.bf16 %v384_v43, %v372_v47  ;;  %v413_v33 = vsub.f32 %v2899_v22, %v3852_v27  ;;  %v3859_v47 = vand.u32 4294901760, %v2905_v0  ;;  %v419_v34 = vsub.f32 %v2903_v63, %v3858_v17 }
  0x68   :  { %v408_v49 = vand.u32 4294901760, %v407_v21  ;;  %v3042_v43 = vpack.c.bf16 %v402_v29, %v390_v62  ;;  %v425_v55 = vsub.f32 %v2901_v50, %v3857_v23  ;;  %v3860_v27 = vand.u32 4294901760, %v2909_v8 }
  0x69   :  { %v414_v46 = vand.u32 4294901760, %v413_v33  ;;  %v431_v21 = vsub.f32 %v2905_v0, %v3859_v47  ;;  %v420_v29 = vand.u32 4294901760, %v419_v34  ;;  %v3865_v62 = vand.u32 4294901760, %v2912_v20 }
  0x6a   :  { %v3050_v24 = vpack.c.bf16 %v408_v49, %v396_v1  ;;  %v426_v60 = vand.u32 4294901760, %v425_v55  ;;  %v437_v17 = vsub.f32 %v2909_v8, %v3860_v27  ;;  %v3867_v49 = vand.u32 4294901760, %v2928_v42 }
  0x6b   :  { %v432_v23 = vand.u32 4294901760, %v431_v21  ;;  %v449_v1 = vsub.f32 %v2912_v20, %v3865_v62  ;;  %v443_v55 = vsub.f32 %v2926_v36, %v3866_v56 }
  0x6c   :  { %v3062_v33 = vpack.c.bf16 %v426_v60, %v414_v46  ;;  %v438_v47 = vand.u32 4294901760, %v437_v17  ;;  %v455_v21 = vsub.f32 %v2928_v42, %v3867_v49 }
  0x6d   :  { %v3070_v34 = vpack.c.bf16 %v432_v23, %v420_v29  ;;  %v450_v27 = vand.u32 4294901760, %v449_v1  ;;  %v444_v44 = vand.u32 4294901760, %v443_v55 }
  0x6e   :  { %v456_v41 = vand.u32 4294901760, %v455_v21 }
  0x6f   :  { %v3075_v60 = vpack.c.bf16 %v450_v27, %v438_v47  ;;  %v3868_v27 = vlaneseq }
  0x70   :  { %v3077_v46 = vpack.c.bf16 %v456_v41, %v444_v44  ;;  %v3975_v41 = vmov 0  }
  0x71   :  { %v3112_v55 = vand.u32 127, %v3868_v27 }
  0x73   :  { %3974 = vst [vmem:[#allocation27_spill] sm:$0xff] %v3112_v55 }
  0xb8   :  { %v79_v1 = vpop.permute.xlu1 %78  ;;  %v68_v29 = vpop.permute.xlu0 %67 }
  0xb9   :  { %vm69_vm0 = vcmp.eq.s32.totalorder %v3112_v55, %v68_v29  ;;  %vm80_vm1 = vcmp.eq.s32.totalorder %v3112_v55, %v79_v1 }
  0xba   :  { %v70_v49 = vsel %vm69_vm0, 1, %v3975_v41  ;;  %v81_v17 = vsel %vm80_vm1, 1, %v3975_v41 }
  0xbd   :  { %v85_v21 = vpop.permute.xlu1 %84  ;;  %v73_v23 = vpop.permute.xlu0 %72 }
  0xbe   :  { %vm74_vm2 = vcmp.eq.s32.totalorder %v3112_v55, %v73_v23  ;;  %vm86_vm3 = vcmp.eq.s32.totalorder %v3112_v55, %v85_v21 }
  0xbf   :  { %v75_v44 = vsel %vm74_vm2, 1, %v3975_v41  ;;  %v87_v29 = vsel %vm86_vm3, 1, %v3975_v41 }
  0xc0   :  { %v76_v47 = vadd.s32 %v75_v44, %v70_v49 }
  0xc2   :  { %v82_v56 = vadd.s32 %v81_v17, %v76_v47  ;;  %v91_v27 = vpop.permute.xlu1 %90  ;;  %v97_v62 = vpop.permute.xlu0 %96 }
  0xc3   :  { %vm92_vm4 = vcmp.eq.s32.totalorder %v3112_v55, %v91_v27  ;;  %vm98_vm5 = vcmp.eq.s32.totalorder %v3112_v55, %v97_v62 }
  0xc4   :  { %v88_v1 = vadd.s32 %v87_v29, %v82_v56  ;;  %v93_v23 = vsel %vm92_vm4, 1, %v3975_v41  ;;  %v99_v25 = vsel %vm98_vm5, 1, %v3975_v41  ;;  %v1961_v56 = vld [vmem:[%s3804_s2] ss:$0 sm:$0xff] }
  0xc6   :  { %v94_v28 = vadd.s32 %v93_v23, %v88_v1  ;;  %v3976_v23 = vmov 0.0  }
  0xc7   :  { %v103_v14 = vpop.permute.xlu1 %102 }
  0xc8   :  { %vm104_vm6 = vcmp.eq.s32.totalorder %v3112_v55, %v103_v14  ;;  %v100_v49 = vadd.s32 %v99_v25, %v94_v28 }
  0xc9   :  { %v105_v17 = vsel %vm104_vm6, 1, %v3975_v41 }
  0xca   :  { %v106_v47 = vadd.s32 %v105_v17, %v100_v49  ;;  %v1033_v49 = vld [vmem:[#allocation7 + $0x10] sm:$0xff]  ;;  %v1034_v17 = vld [vmem:[#allocation7 + $0x18] sm:$0xff] }
  0xcc   :  { %v109_v44 = vpop.permute.xlu1 %108 }
  0xcd   :  { %vm110_vm7 = vcmp.eq.s32.totalorder %v3112_v55, %v109_v44  ;;  %v1051_v44 = vld [vmem:[#allocation7 + $0xa0] sm:$0xff] }
  0xce   :  { %v111_v27 = vsel %vm110_vm7, 1, %v3975_v41 }
  0xcf   :  { %v112_v21 = vadd.s32 %v111_v27, %v106_v47 }
  0xd1   :  { %v113_v62 = vcvt.s32.f32 %v112_v21 }
  0xd3   :  { %v3133_v29 = vand.u32 4294901760, %v113_v62  ;;  %v121_v1 = vmul.f32 %v1961_v56, %v113_v62 }
  0xd5   :  { %v3136_v14 = vsub.f32 %v113_v62, %v3133_v29  ;;  %122 = vadd.xlane.f32.xlu0 %v121_v1  ;;  %v1052_v62 = vld [vmem:[#allocation7 + $0xa8] sm:$0xff]  ;;  %v1035_v1 = vld [vmem:[#allocation7 + $0x20] sm:$0xff] }
  0xd7   :  { %v3875_v25 = vand.u32 4294901760, %v3136_v14 }
  0xd9   :  { %v258_v28 = vsub.f32 %v3136_v14, %v3875_v25  ;;  %v1053_v25 = vld [vmem:[#allocation7 + $0xb0] sm:$0xff] }
  0xda   :  { %v1137_v55 = vand.u32 4294901760, %v1053_v25 }
  0xdb   :  { %v259_v41 = vand.u32 4294901760, %v258_v28  ;;  %v1036_v28 = vld [vmem:[#allocation7 + $0x28] sm:$0xff] }
  0xdd   :  { %260 = vmatmul.mubr.f32.vlgmr.msra.gmra.mrb[0].mxu0 %v259_v41 }
  0xde   :  { %2208 = vmatpush1.bf16.msra.mxu0 %v2954_v30  ;;  %490 = vmatprep.mubr.f32.mxu0 %v3976_v23  ;;  %v3977_v30 = vpack.c.bf16 %v2873_v35, %v2868_v32 }
  0xdf   :  { %2210 = vmatprep.subr.bf16.mxu0 %v2969_v26 }
  0xe2   :  { %2212 = vmatpush1.bf16.msra.mxu0 %v2971_v6  ;;  %v3978_v6 = vpack.c.bf16 %v2802_v16, %v2800_v15 }
  0xe3   :  { %2214 = vmatprep.subr.bf16.mxu0 %v2985_v48  ;;  %v1032_v48 = vld [vmem:[#allocation7 + $0x8] sm:$0xff] }
  0xe6   :  { %2216 = vmatpush1.bf16.msra.mxu0 %v2991_v4  ;;  %v1031_v4 = vld [vmem:[#allocation7] sm:$0xff] }
  0xe7   :  { %2218 = vmatprep.subr.bf16.mxu0 %v3002_v3 }
  0xea   :  { %2220 = vmatpush1.bf16.msra.mxu0 %v3014_v7  ;;  %v1048_v7 = vld [vmem:[#allocation7 + $0x88] sm:$0xff] }
  0xeb   :  { %2222 = vmatprep.subr.bf16.mxu0 %v3022_v5  ;;  %v1047_v5 = vld [vmem:[#allocation7 + $0x80] sm:$0xff]  ;;  %v1122_v3 = vand.u32 4294901760, %v1048_v7 }
  0xec   :  { %v1119_v26 = vand.u32 4294901760, %v1047_v5 }
  0xed   :  { %v3173_v21 = vsub.f32 %v1048_v7, %v1122_v3 }
  0xee   :  { %2224 = vmatpush1.bf16.msra.mxu0 %v3030_v45  ;;  %v1071_v45 = vand.u32 4294901760, %v1031_v4  ;;  %v3169_v47 = vpack.c.bf16 %v1122_v3, %v1119_v26  ;;  %v3171_v27 = vsub.f32 %v1047_v5, %v1119_v26  ;;  %v3988_v5 = vpack.c.bf16 %v2821_v40, %v2817_v39 }
  0xef   :  { %2226 = vmatprep.subr.bf16.mxu0 %v3042_v43  ;;  %v1049_v43 = vld [vmem:[#allocation7 + $0x90] sm:$0xff]  ;;  %3982 = vst [vmem:[#allocation30_spill] sm:$0xff] %v3173_v21  ;;  %v1080_v26 = vand.u32 4294901760, %v1034_v17  ;;  %v1131_v3 = vand.u32 4294901760, %v1051_v44 }
  0xf0   :  { %3980 = vst [vmem:[#allocation28_spill] sm:$0xff] %v3169_v47  ;;  %3981 = vst [vmem:[#allocation29_spill] sm:$0xff] %v3171_v27  ;;  %v3175_v56 = vsub.f32 %v1031_v4, %v1071_v45  ;;  %2366 = vmatprep.subr.bf16.mxu1 %v3169_v47  ;;  %v1077_v4 = vand.u32 4294901760, %v1033_v49 }
  0xf1   :  { %v3202_v47 = vsub.f32 %v1051_v44, %v1131_v3  ;;  %v3999_v44 = vpack.c.bf16 %v2846_v10, %v2844_v9 }
  0xf2   :  { %2228 = vmatpush1.bf16.msra.mxu0 %v3050_v24  ;;  %v1050_v24 = vld [vmem:[#allocation7 + $0x98] sm:$0xff]  ;;  %3983 = vst [vmem:[#allocation31_spill] sm:$0xff] %v3175_v56  ;;  %v3996_v56 = vpack.c.bf16 %v2835_v54, %v2833_v53 }
  0xf3   :  { %2230 = vmatprep.subr.bf16.mxu0 %v3062_v33  ;;  %v3979_v33 = vpack.c.bf16 %v2815_v38, %v2813_v37  ;;  %3992 = vst [vmem:[#allocation38_spill] sm:$0xff] %v3202_v47  ;;  %v4036_v47 = vand.u32 4294901760, %v3136_v14 }
  0xf6   :  { %2232 = vmatpush1.bf16.msra.mxu0 %v3070_v34  ;;  %v1074_v34 = vand.u32 4294901760, %v1032_v48 }
  0xf7   :  { %2234 = vmatprep.subr.bf16.mxu0 %v3075_v60  ;;  %v1125_v60 = vand.u32 4294901760, %v1049_v43 }
  0xf8   :  { %v3177_v41 = vpack.c.bf16 %v1074_v34, %v1071_v45  ;;  %v1134_v45 = vand.u32 4294901760, %v1052_v62 }
  0xfa   :  { %2236 = vmatpush1.bf16.msra.mxu0 %v3077_v46  ;;  %v1128_v46 = vand.u32 4294901760, %v1050_v24  ;;  %3984 = vst [vmem:[#allocation32_spill] sm:$0xff] %v3177_v41  ;;  %2368 = vmatpush3.bf16.msra.mxu1 %v3177_v41  ;;  %v3206_v41 = vsub.f32 %v1052_v62, %v1134_v45 }
  0xfb   :  { %2238 = vmatprep.subr.bf16.mxu0 %v3977_v30  ;;  %v3179_v30 = vsub.f32 %v1032_v48, %v1074_v34  ;;  %v3990_v48 = vpack.c.bf16 %v2831_v52, %v2829_v51  ;;  %v1086_v34 = vand.u32 4294901760, %v1036_v28 }
  0xfc   :  { %v3189_v7 = vsub.f32 %v1050_v24, %v1128_v46  ;;  %v3198_v24 = vsub.f32 %v1033_v49, %v1077_v4  ;;  %3994 = vst [vmem:[#allocation40_spill] sm:$0xff] %v3206_v41  ;;  %v3215_v49 = vsub.f32 %v1053_v25, %v1137_v55 }
  0xfd   :  { %492 = vmatmul.mubr.f32.vlgmr.msra.gmra.mrb[0].mxu0 %v3133_v29  ;;  %3985 = vst [vmem:[#allocation33_spill] sm:$0xff] %v3179_v30 }
  0xfe   :  { %2240 = vmatpush1.bf16.msra.mxu0 %v3978_v6  ;;  %626 = vmatprep.mubr.f32.mxu0 %v3976_v23  ;;  %v3181_v6 = vpack.c.bf16 %v1128_v46, %v1125_v60  ;;  %3989 = vst [vmem:[#allocation36_spill] sm:$0xff] %v3189_v7  ;;  %v3200_v46 = vsub.f32 %v1034_v17, %v1080_v26  ;;  %v1038_v7 = vld [vmem:[#allocation7 + $0x38] sm:$0xff]  ;;  %3998 = vst [vmem:[#allocation43_spill] sm:$0xff] %v3215_v49 }
  0xff   :  { %2242 = vmatprep.subr.bf16.mxu0 %v3979_v33  ;;  %v3183_v33 = vsub.f32 %v1049_v43, %v1125_v60  ;;  %v1083_v43 = vand.u32 4294901760, %v1035_v1  ;;  %v1054_v60 = vld [vmem:[#allocation7 + $0xb8] sm:$0xff] }
 0x100   :  { %3986 = vst [vmem:[#allocation34_spill] sm:$0xff] %v3181_v6  ;;  %2370 = vmatprep.subr.bf16.mxu1 %v3181_v6  ;;  %v3213_v6 = vsub.f32 %v1036_v28, %v1086_v34  ;;  %v1140_v21 = vand.u32 4294901760, %v1054_v60 }
 0x101   :  { %3987 = vst [vmem:[#allocation35_spill] sm:$0xff] %v3183_v33  ;;  %v1037_v33 = vld [vmem:[#allocation7 + $0x30] sm:$0xff]  ;;  %v3208_v30 = vsub.f32 %v1035_v1, %v1083_v43  ;;  %v3221_v62 = vpack.c.bf16 %v1086_v34, %v1083_v43  ;;  %v1092_v1 = vand.u32 4294901760, %v1038_v7  ;;  %v4012_v43 = vpack.c.bf16 %v2905_v0, %v2903_v63 }
 0x102   :  { %2244 = vmatpush1.bf16.msra.mxu0 %v3988_v5  ;;  %v3196_v5 = vpack.c.bf16 %v1080_v26, %v1077_v4  ;;  %3997 = vst [vmem:[#allocation42_spill] sm:$0xff] %v3213_v6  ;;  %v1089_v17 = vand.u32 4294901760, %v1037_v33  ;;  %v3224_v4 = vpack.c.bf16 %v1140_v21, %v1137_v55  ;;  %v4005_v26 = vpack.c.bf16 %v2850_v13, %v2848_v12 }
 0x103   :  { %2246 = vmatprep.subr.bf16.mxu0 %v3990_v48  ;;  %v3204_v48 = vpack.c.bf16 %v1134_v45, %v1131_v3  ;;  %3995 = vst [vmem:[#allocation41_spill] sm:$0xff] %v3208_v30  ;;  %4000 = vst [vmem:[#allocation44_spill] sm:$0xff] %v3221_v62  ;;  %v3230_v25 = vsub.f32 %v1038_v7, %v1092_v1  ;;  %v4006_v3 = vpack.c.bf16 %v2856_v19, %v2854_v18 }
 0x104   :  { %3991 = vst [vmem:[#allocation37_spill] sm:$0xff] %v3196_v5  ;;  %2372 = vmatpush3.bf16.msra.mxu1 %v3196_v5  ;;  %4001 = vst [vmem:[#allocation45_spill] sm:$0xff] %v3224_v4  ;;  %v3228_v28 = vsub.f32 %v1037_v33, %v1089_v17  ;;  %v3239_v45 = vpack.c.bf16 %v1092_v1, %v1089_v17  ;;  %v4008_v55 = vpack.c.bf16 %v2888_v58, %v2886_v57  ;;  %v4015_v17 = vld [vmem:[#allocation12_spill] sm:$0xff]  ;;  %v4017_v1 = vld [vmem:[#allocation14_spill] sm:$0xff] }
 0x105   :  { %3993 = vst [vmem:[#allocation39_spill] sm:$0xff] %v3204_v48  ;;  %2374 = vmatprep.subr.bf16.mxu1 %v3204_v48  ;;  %4004 = vst [vmem:[#allocation48_spill] sm:$0xff] %v3230_v25  ;;  %v4010_v33 = vpack.c.bf16 %v2897_v2, %v2895_v31  ;;  %v4011_v7 = vpack.c.bf16 %v2901_v50, %v2899_v22  ;;  %v4013_v34 = vpack.c.bf16 %v2912_v20, %v2909_v8  ;;  %v4031_v25 = vld [vmem:[#allocation26_spill] sm:$0xff] }
 0x106   :  { %2248 = vmatpush1.bf16.msra.mxu0 %v3996_v56  ;;  %v3226_v56 = vsub.f32 %v1054_v60, %v1140_v21  ;;  %4003 = vst [vmem:[#allocation47_spill] sm:$0xff] %v3228_v28  ;;  %4007 = vst [vmem:[#allocation49_spill] sm:$0xff] %v3239_v45  ;;  %v4009_v21 = vpack.c.bf16 %v2892_v61, %v2890_v59  ;;  %v4014_v60 = vpack.c.bf16 %v2928_v42, %v2926_v36 }
 0x107   :  { %2250 = vmatprep.subr.bf16.mxu0 %v3999_v44  ;;  %v4016_v44 = vld [vmem:[#allocation13_spill] sm:$0xff]  ;;  %v4030_v48 = vand.u32 4294901760, %v2873_v35  ;;  %v4032_v28 = vand.u32 4294901760, %v2800_v15  ;;  %v4034_v6 = vand.u32 4294901760, %v2813_v37  ;;  %v4035_v30 = vand.u32 4294901760, %v2815_v38 }
 0x108   :  { %4002 = vst [vmem:[#allocation46_spill] sm:$0xff] %v3226_v56  ;;  %2376 = vmatpush3.bf16.msra.mxu1 %v3221_v62  ;;  %v4029_v62 = vand.u32 4294901760, %v2868_v32  ;;  %v4033_v56 = vand.u32 4294901760, %v2802_v16  ;;  %v4037_v32 = vand.u32 4294901760, %v2817_v39  ;;  %v4038_v35 = vand.u32 4294901760, %v2821_v40 }
 0x109   :  { %2378 = vmatprep.subr.bf16.mxu1 %v3224_v4  ;;  %v4028_v4 = vld [vmem:[#allocation25_spill] sm:$0xff]  ;;  %v2305_v41 = vpack.c.bf16 %v4035_v30, %v4034_v6  ;;  %v4039_v15 = vand.u32 4294901760, %v2829_v51  ;;  %v4040_v16 = vand.u32 4294901760, %v2831_v52  ;;  %v4041_v38 = vand.u32 4294901760, %v2833_v53 }
 0x10a   :  { %2252 = vmatpush1.bf16.msra.mxu0 %v4005_v26  ;;  %v4018_v26 = vld [vmem:[#allocation15_spill] sm:$0xff]  ;;  %v2301_v5 = vpack.c.bf16 %v4030_v48, %v4029_v62  ;;  %v2303_v49 = vpack.c.bf16 %v4033_v56, %v4032_v28  ;;  %v2307_v48 = vpack.c.bf16 %v4038_v35, %v4037_v32  ;;  %v4043_v39 = vand.u32 4294901760, %v2844_v9 }
 0x10b   :  { %2254 = vmatprep.subr.bf16.mxu0 %v4006_v3  ;;  %v4019_v3 = vld [vmem:[#allocation16_spill] sm:$0xff]  ;;  %v2309_v37 = vpack.c.bf16 %v4040_v16, %v4039_v15  ;;  %v4044_v40 = vand.u32 4294901760, %v2846_v10  ;;  %v4046_v51 = vand.u32 4294901760, %v2850_v13  ;;  %v4047_v52 = vand.u32 4294901760, %v2854_v18 }
 0x10c   :  { %2380 = vmatpush3.bf16.msra.mxu1 %v3239_v45  ;;  %v4027_v45 = vld [vmem:[#allocation24_spill] sm:$0xff]  ;;  %v4048_v53 = vand.u32 4294901760, %v2856_v19  ;;  %v4050_v9 = vand.u32 4294901760, %v2888_v58  ;;  %v4051_v10 = vand.u32 4294901760, %v2890_v59  ;;  %v4053_v13 = vand.u32 4294901760, %v2895_v31 }
 0x10d   :  { %v2313_v30 = vpack.c.bf16 %v4044_v40, %v4043_v39  ;;  %v4054_v18 = vand.u32 4294901760, %v2897_v2  ;;  %v4055_v19 = vand.u32 4294901760, %v2899_v22  ;;  %v4057_v58 = vand.u32 4294901760, %v2903_v63  ;;  %v1044_v15 = vld [vmem:[#allocation7 + $0x68] sm:$0xff] }
 0x10e   :  { %2256 = vmatpush1.bf16.msra.mxu0 %v4008_v55  ;;  %v4020_v55 = vld [vmem:[#allocation17_spill] sm:$0xff]  ;;  %v4058_v59 = vand.u32 4294901760, %v2905_v0  ;;  %v4060_v31 = vand.u32 4294901760, %v2912_v20  ;;  %v4061_v2 = vand.u32 4294901760, %v2926_v36  ;;  %v4062_v22 = vand.u32 4294901760, %v2928_v42  ;;  %v1040_v20 = vld [vmem:[#allocation7 + $0x48] sm:$0xff] }
 0x10f   :  { %2258 = vmatprep.subr.bf16.mxu0 %v4009_v21  ;;  %v4021_v21 = vld [vmem:[#allocation18_spill] sm:$0xff]  ;;  %v2323_v56 = vpack.c.bf16 %v4054_v18, %v4053_v13  ;;  %v1098_v42 = vand.u32 4294901760, %v1040_v20 }
 0x110   :  { %v2327_v32 = vpack.c.bf16 %v4058_v59, %v4057_v58  ;;  %v4070_v59 = vld [vmem:[#allocation31_spill] sm:$0xff] }
 0x111   :  { %v3388_v40 = vsub.f32 %v1040_v20, %v1098_v42  ;;  %v4074_v20 = vld [vmem:[#allocation35_spill] sm:$0xff] }
 0x112   :  { %2260 = vmatpush1.bf16.msra.mxu0 %v4010_v33  ;;  %v4022_v33 = vld [vmem:[#allocation19_spill] sm:$0xff] }
 0x113   :  { %2262 = vmatprep.subr.bf16.mxu0 %v4011_v7  ;;  %v4023_v7 = vld [vmem:[#allocation20_spill] sm:$0xff] }
 0x116   :  { %2264 = vmatpush1.bf16.msra.mxu0 %v4012_v43  ;;  %v4024_v43 = vld [vmem:[#allocation21_spill] sm:$0xff] }
 0x117   :  { %2266 = vmatprep.subr.bf16.mxu0 %v4013_v34  ;;  %v4025_v34 = vld [vmem:[#allocation22_spill] sm:$0xff] }
 0x11a   :  { %2268 = vmatpush1.bf16.msra.mxu0 %v4014_v60  ;;  %v4026_v60 = vld [vmem:[#allocation23_spill] sm:$0xff] }
 0x11b   :  { %2270 = vmatprep.subr.bf16.mxu0 %v2796_v11 }
 0x11d   :  { %629 = vmatmul.mubr.f32.vlgmr.msra.gmra.mrb[0].mxu0 %v3136_v14  ;;  %v4042_v14 = vand.u32 4294901760, %v2835_v54  ;;  %v4049_v54 = vand.u32 4294901760, %v2886_v57  ;;  %v4056_v57 = vand.u32 4294901760, %v2901_v50  ;;  %v1056_v50 = vld [vmem:[#allocation7 + $0xc8] sm:$0xff] }
 0x11e   :  { %2272 = vmatpush1.bf16.msra.mxu0 %v4015_v17  ;;  %731 = vmatprep.mubr.f32.mxu0 %v3976_v23  ;;  %v1146_v0 = vand.u32 4294901760, %v1056_v50 }
 0x11f   :  { %2274 = vmatprep.subr.bf16.mxu0 %v4016_v44  ;;  %v2325_v28 = vpack.c.bf16 %v4056_v57, %v4055_v19  ;;  %v3926_v57 = vand.u32 4294901760, %v3171_v27 }
 0x122   :  { %2276 = vmatpush1.bf16.msra.mxu0 %v4017_v1 }
 0x123   :  { %2278 = vmatprep.subr.bf16.mxu0 %v4018_v26 }
 0x126   :  { %2280 = vmatpush1.bf16.msra.mxu0 %v4019_v3 }
 0x127   :  { %2282 = vmatprep.subr.bf16.mxu0 %v4020_v55 }
 0x12a   :  { %2284 = vmatpush1.bf16.msra.mxu0 %v4021_v21 }
 0x12b   :  { %2286 = vmatprep.subr.bf16.mxu0 %v4022_v33 }
 0x12e   :  { %2288 = vmatpush1.bf16.msra.mxu0 %v4023_v7 }
 0x12f   :  { %2290 = vmatprep.subr.bf16.mxu0 %v4024_v43 }
 0x132   :  { %2292 = vmatpush1.bf16.msra.mxu0 %v4025_v34 }
 0x133   :  { %2294 = vmatprep.subr.bf16.mxu0 %v4026_v60 }
 0x136   :  { %2296 = vmatpush1.bf16.msra.mxu0 %v4027_v45 }
 0x137   :  { %2298 = vmatprep.subr.bf16.mxu0 %v4028_v4 }
 0x13a   :  { %2300 = vmatpush1.bf16.msra.mxu0 %v4031_v25 }
 0x13b   :  { %2302 = vmatprep.subr.bf16.mxu0 %v2301_v5  ;;  %v2317_v5 = vpack.c.bf16 %v4048_v53, %v4047_v52 }
 0x13d   :  { %735 = vmatmul.mubr.f32.vlgmr.msra.gmra.mrb[0].mxu0 %v4036_v47  ;;  %v2311_v47 = vpack.c.bf16 %v4042_v14, %v4041_v38 }
 0x13e   :  { %2304 = vmatpush1.bf16.msra.mxu0 %v2303_v49  ;;  %901 = vmatprep.mubr.f32.mxu0 %v3976_v23  ;;  %v2319_v49 = vpack.c.bf16 %v4050_v9, %v4049_v54  ;;  %v1046_v54 = vld [vmem:[#allocation7 + $0x78] sm:$0xff] }
 0x13f   :  { %2306 = vmatprep.subr.bf16.mxu0 %v2305_v41  ;;  %v4045_v41 = vand.u32 4294901760, %v2848_v12  ;;  %v4052_v12 = vand.u32 4294901760, %v2892_v61  ;;  %v4059_v61 = vand.u32 4294901760, %v2909_v8  ;;  %v1039_v8 = vld [vmem:[#allocation7 + $0x40] sm:$0xff]  ;;  %v1116_v19 = vand.u32 4294901760, %v1046_v54 }
 0x140   :  { %v1095_v36 = vand.u32 4294901760, %v1039_v8 }
 0x141   :  { %v2315_v6 = vpack.c.bf16 %v4046_v51, %v4045_v41  ;;  %v2321_v62 = vpack.c.bf16 %v4052_v12, %v4051_v10  ;;  %v2329_v35 = vpack.c.bf16 %v4060_v31, %v4059_v61  ;;  %v1062_v41 = vld [vmem:[#allocation7 + $0xf8] sm:$0xff]  ;;  %v1045_v51 = vld [vmem:[#allocation7 + $0x70] sm:$0xff] }
 0x142   :  { %2308 = vmatpush1.bf16.msra.mxu0 %v2307_v48  ;;  %v2331_v48 = vpack.c.bf16 %v4062_v22, %v4061_v2  ;;  %v3386_v39 = vsub.f32 %v1039_v8, %v1095_v36  ;;  %v1164_v18 = vand.u32 4294901760, %v1062_v41 }
 0x143   :  { %2310 = vmatprep.subr.bf16.mxu0 %v2309_v37  ;;  %v1110_v37 = vand.u32 4294901760, %v1044_v15 }
 0x146   :  { %2312 = vmatpush1.bf16.msra.mxu0 %v2311_v47  ;;  %v3384_v47 = vsub.f32 %v1056_v50, %v1146_v0 }
 0x147   :  { %2314 = vmatprep.subr.bf16.mxu0 %v2313_v30  ;;  %v1061_v30 = vld [vmem:[#allocation7 + $0xf0] sm:$0xff] }
 0x148   :  { %v1161_v13 = vand.u32 4294901760, %v1061_v30 }
 0x14a   :  { %2316 = vmatpush1.bf16.msra.mxu0 %v2315_v6  ;;  %v3413_v61 = vpack.c.bf16 %v1164_v18, %v1161_v13  ;;  %v3415_v31 = vsub.f32 %v1061_v30, %v1161_v13 }
 0x14b   :  { %2318 = vmatprep.subr.bf16.mxu0 %v2317_v5 }
 0x14c   :  { %4071 = vst [vmem:[#allocation18_spill] sm:$0xff] %v3413_v61 }
 0x14e   :  { %2320 = vmatpush1.bf16.msra.mxu0 %v2319_v49 }
 0x14f   :  { %2322 = vmatprep.subr.bf16.mxu0 %v2321_v62  ;;  %v3407_v62 = vsub.f32 %v1044_v15, %v1110_v37 }
 0x152   :  { %2324 = vmatpush1.bf16.msra.mxu0 %v2323_v56  ;;  %v1113_v56 = vand.u32 4294901760, %v1045_v51 }
 0x153   :  { %2326 = vmatprep.subr.bf16.mxu0 %v2325_v28  ;;  %v4069_v28 = vld [vmem:[#allocation30_spill] sm:$0xff] }
 0x154   :  { %v3922_v58 = vand.u32 4294901760, %v4069_v28  ;;  %v3419_v2 = vsub.f32 %v1045_v51, %v1113_v56  ;;  %v3421_v22 = vpack.c.bf16 %v1116_v19, %v1113_v56  ;;  %v4078_v56 = vld [vmem:[#allocation41_spill] sm:$0xff] }
 0x156   :  { %2328 = vmatpush1.bf16.msra.mxu0 %v2327_v32  ;;  %v3920_v32 = vand.u32 4294901760, %v4070_v59  ;;  %4072 = vst [vmem:[#allocation19_spill] sm:$0xff] %v3421_v22  ;;  %v1305_v50 = vsub.f32 %v4069_v28, %v3922_v58 }
 0x157   :  { %2330 = vmatprep.subr.bf16.mxu0 %v2329_v35  ;;  %v3417_v35 = vsub.f32 %v1062_v41, %v1164_v18  ;;  %v4077_v41 = vld [vmem:[#allocation40_spill] sm:$0xff] }
 0x158   :  { %v3906_v51 = vand.u32 4294901760, %v4077_v41 }
 0x15a   :  { %2332 = vmatpush1.bf16.msra.mxu0 %v2331_v48  ;;  %v3423_v48 = vsub.f32 %v1046_v54, %v1116_v19  ;;  %v3909_v19 = vand.u32 4294901760, %v4078_v56 }
 0x15b   :  { %2334 = vmatprep.subr.bf16.mxu0 %v2796_v11  ;;  %v1055_v11 = vld [vmem:[#allocation7 + $0xc0] sm:$0xff] }
 0x15c   :  { %v1143_v63 = vand.u32 4294901760, %v1055_v11 }
 0x15d   :  { %903 = vmatmul.mubr.f32.vlgmr.msra.gmra.mrb[0].mxu0 %v3133_v29 }
 0x15e   :  { %2336 = vmatpush1.bf16.msra.mxu0 %v4015_v17  ;;  %1005 = vmatprep.mubr.f32.mxu0 %v3976_v23  ;;  %v3368_v23 = vpack.c.bf16 %v1146_v0, %v1143_v63  ;;  %v3370_v17 = vpack.c.bf16 %v1098_v42, %v1095_v36  ;;  %v3382_v14 = vsub.f32 %v1055_v11, %v1143_v63  ;;  %v4073_v0 = vld [vmem:[#allocation33_spill] sm:$0xff]  ;;  %v3914_v36 = vand.u32 4294901760, %v4074_v20  ;;  %v4075_v42 = vld [vmem:[#allocation36_spill] sm:$0xff] }
 0x15f   :  { %2338 = vmatprep.subr.bf16.mxu0 %v4016_v44  ;;  %v1057_v44 = vld [vmem:[#allocation7 + $0xd0] sm:$0xff]  ;;  %v1298_v11 = vsub.f32 %v3171_v27, %v3926_v57  ;;  %v1186_v63 = vsub.f32 %v4070_v59, %v3920_v32  ;;  %v3918_v8 = vand.u32 4294901760, %v4073_v0 }
 0x160   :  { %4063 = vst [vmem:[#allocation12_spill] sm:$0xff] %v3368_v23  ;;  %4064 = vst [vmem:[#allocation13_spill] sm:$0xff] %v3370_v17  ;;  %2382 = vmatprep.subr.bf16.mxu1 %v3368_v23 }
 0x161   :  { %2384 = vmatpush3.bf16.msra.mxu1 %v3370_v17 }
 0x162   :  { %2340 = vmatpush1.bf16.msra.mxu0 %v4017_v1  ;;  %v1041_v1 = vld [vmem:[#allocation7 + $0x50] sm:$0xff] }
 0x163   :  { %2342 = vmatprep.subr.bf16.mxu0 %v4018_v26  ;;  %v1101_v26 = vand.u32 4294901760, %v1041_v1 }
 0x165   :  { %v3394_v53 = vsub.f32 %v1041_v1, %v1101_v26  ;;  %v3908_v1 = vand.u32 4294901760, %v3200_v46 }
 0x166   :  { %2344 = vmatpush1.bf16.msra.mxu0 %v4019_v3 }
 0x167   :  { %2346 = vmatprep.subr.bf16.mxu0 %v4020_v55 }
 0x16a   :  { %2348 = vmatpush1.bf16.msra.mxu0 %v4021_v21 }
 0x16b   :  { %2350 = vmatprep.subr.bf16.mxu0 %v4022_v33  ;;  %v1059_v33 = vld [vmem:[#allocation7 + $0xe0] sm:$0xff] }
 0x16e   :  { %2352 = vmatpush1.bf16.msra.mxu0 %v4023_v7  ;;  %v1060_v7 = vld [vmem:[#allocation7 + $0xe8] sm:$0xff] }
 0x16f   :  { %2354 = vmatprep.subr.bf16.mxu0 %v4024_v43  ;;  %v1155_v43 = vand.u32 4294901760, %v1059_v33 }
 0x171   :  { %v3399_v9 = vsub.f32 %v1059_v33, %v1155_v43 }
 0x172   :  { %2356 = vmatpush1.bf16.msra.mxu0 %v4025_v34  ;;  %v1158_v34 = vand.u32 4294901760, %v1060_v7 }
 0x173   :  { %2358 = vmatprep.subr.bf16.mxu0 %v4026_v60  ;;  %v1043_v60 = vld [vmem:[#allocation7 + $0x60] sm:$0xff] }
 0x174   :  { %v1107_v16 = vand.u32 4294901760, %v1043_v60  ;;  %v3380_v38 = vpack.c.bf16 %v1158_v34, %v1155_v43  ;;  %v3401_v49 = vsub.f32 %v1060_v7, %v1158_v34  ;;  %v1207_v34 = vsub.f32 %v3200_v46, %v3908_v1 }
 0x176   :  { %2360 = vmatpush1.bf16.msra.mxu0 %v4027_v45  ;;  %v1058_v45 = vld [vmem:[#allocation7 + $0xd8] sm:$0xff]  ;;  %4067 = vst [vmem:[#allocation16_spill] sm:$0xff] %v3380_v38  ;;  %v3403_v10 = vpack.c.bf16 %v1110_v37, %v1107_v16  ;;  %v3405_v12 = vsub.f32 %v1043_v60, %v1107_v16  ;;  %v1208_v13 = vand.u32 4294901760, %v1207_v34 }
 0x177   :  { %2362 = vmatprep.subr.bf16.mxu0 %v4028_v4  ;;  %v1149_v4 = vand.u32 4294901760, %v1057_v44  ;;  %v4076_v60 = vld [vmem:[#allocation38_spill] sm:$0xff] }
 0x178   :  { %4068 = vst [vmem:[#allocation17_spill] sm:$0xff] %v3403_v10  ;;  %v3907_v15 = vand.u32 4294901760, %v4076_v60  ;;  %v3938_v57 = vand.u32 4294901760, %v3405_v12 }
 0x179   :  { %v3390_v6 = vsub.f32 %v1057_v44, %v1149_v4  ;;  %v3913_v44 = vand.u32 4294901760, %v4075_v42 }
 0x17a   :  { %2364 = vmatpush1.bf16.msra.mxu0 %v4031_v25  ;;  %v1152_v25 = vand.u32 4294901760, %v1058_v45  ;;  %v1326_v18 = vsub.f32 %v4076_v60, %v3907_v15 }
 0x17b   :  { %v1319_v33 = vsub.f32 %v4075_v42, %v3913_v44  ;;  %v3921_v44 = vand.u32 4294901760, %v3384_v47  ;;  %v3924_v32 = vand.u32 4294901760, %v3390_v6 }
 0x17c   :  { %v3374_v55 = vpack.c.bf16 %v1152_v25, %v1149_v4  ;;  %v3392_v52 = vsub.f32 %v1058_v45, %v1152_v25  ;;  %v1299_v45 = vand.u32 4294901760, %v1298_v11  ;;  %v1306_v4 = vand.u32 4294901760, %v1305_v50 }
 0x17d   :  { %1007 = vmatmul.mubr.f32.vlgmr.msra.gmra.mrb[0].mxu0 %v3133_v29  ;;  %v1042_v29 = vld [vmem:[#allocation7 + $0x58] sm:$0xff]  ;;  %v3911_v25 = vand.u32 4294901760, %v3198_v24  ;;  %v1320_v30 = vand.u32 4294901760, %v1319_v33  ;;  %v1214_v33 = vsub.f32 %v4078_v56, %v3909_v19 }
 0x17e   :  { %v1104_v3 = vand.u32 4294901760, %v1042_v29  ;;  %4065 = vst [vmem:[#allocation14_spill] sm:$0xff] %v3374_v55  ;;  %2386 = vmatprep.subr.bf16.mxu1 %v3374_v55  ;;  %v2397_v7 = vpack.c.bf16 %v1306_v4, %v1299_v45  ;;  %v4079_v45 = vld [vmem:[#allocation42_spill] sm:$0xff] }
 0x17f   :  { %v1200_v43 = vsub.f32 %v3198_v24, %v3911_v25  ;;  %v3910_v4 = vand.u32 4294901760, %v4079_v45  ;;  %v1215_v15 = vand.u32 4294901760, %v1214_v33 }
 0x180   :  { %v3376_v21 = vpack.c.bf16 %v1104_v3, %v1101_v26  ;;  %v3396_v5 = vsub.f32 %v1042_v29, %v1104_v3  ;;  %v1187_v29 = vand.u32 4294901760, %v1186_v63  ;;  %v1193_v26 = vsub.f32 %v4073_v0, %v3918_v8 }
 0x181   :  { %v1312_v3 = vsub.f32 %v4074_v20, %v3914_v36  ;;  %v1201_v54 = vand.u32 4294901760, %v1200_v43  ;;  %v1333_v63 = vsub.f32 %v4077_v41, %v3906_v51  ;;  %v3923_v36 = vand.u32 4294901760, %v3386_v39 }
 0x182   :  { %4066 = vst [vmem:[#allocation15_spill] sm:$0xff] %v3376_v21  ;;  %2388 = vmatpush3.bf16.msra.mxu1 %v3376_v21  ;;  %v1194_v16 = vand.u32 4294901760, %v1193_v26  ;;  %v2429_v21 = vpack.c.bf16 %v4069_v28, %v3171_v27 }
 0x183   :  { %2390 = vmatprep.subr.bf16.mxu1 %v3380_v38  ;;  %v1313_v37 = vand.u32 4294901760, %v1312_v3  ;;  %v3470_v26 = vpack.c.bf16 %v1208_v13, %v1201_v54  ;;  %v1327_v3 = vand.u32 4294901760, %v1326_v18  ;;  %v1334_v34 = vand.u32 4294901760, %v1333_v63  ;;  %v4083_v13 = vld [vmem:[#allocation48_spill] sm:$0xff] }
 0x184   :  { %v3462_v11 = vpack.c.bf16 %v1194_v16, %v1187_v29  ;;  %v1221_v29 = vsub.f32 %v4079_v45, %v3910_v4  ;;  %v4081_v16 = vld [vmem:[#allocation46_spill] sm:$0xff]  ;;  %v3917_v18 = vand.u32 4294901760, %v4083_v13 }
 0x185   :  { %v3464_v50 = vpack.c.bf16 %v1320_v30, %v1313_v37  ;;  %v3915_v37 = vand.u32 4294901760, %v4081_v16  ;;  %v4082_v30 = vld [vmem:[#allocation47_spill] sm:$0xff]  ;;  %v3485_v1 = vpack.c.bf16 %v1334_v34, %v1327_v3 }
 0x186   :  { %2392 = vmatpush3.bf16.msra.mxu1 %v3403_v10  ;;  %v3916_v51 = vand.u32 4294901760, %v4082_v30  ;;  %v1222_v19 = vand.u32 4294901760, %v1221_v29  ;;  %v1235_v33 = vsub.f32 %v4083_v13, %v3917_v18  ;;  %v3925_v18 = vand.u32 4294901760, %v3388_v40 }
 0x187   :  { %2394 = vmatprep.subr.bf16.mxu1 %v3413_v61  ;;  %v1347_v63 = vsub.f32 %v4081_v16, %v3915_v37  ;;  %v3942_v61 = vand.u32 4294901760, %v3415_v31 }
 0x188   :  { %v1228_v4 = vsub.f32 %v4082_v30, %v3916_v51  ;;  %v3498_v3 = vpack.c.bf16 %v1222_v19, %v1215_v15  ;;  %v1236_v37 = vand.u32 4294901760, %v1235_v33  ;;  %v1242_v15 = vsub.f32 %v3386_v39, %v3923_v36 }
 0x189   :  { %v1348_v34 = vand.u32 4294901760, %v1347_v63  ;;  %v1249_v33 = vsub.f32 %v3388_v40, %v3925_v18  ;;  %v3929_v36 = vand.u32 4294901760, %v3396_v5 }
 0x18a   :  { %2396 = vmatpush3.bf16.msra.mxu1 %v3421_v22  ;;  %v1229_v29 = vand.u32 4294901760, %v1228_v4 }
 0x18b   :  { %2398 = vmatprep.subr.bf16.mxu1 %v2397_v7  ;;  %v4080_v7 = vld [vmem:[#allocation43_spill] sm:$0xff]  ;;  %v1250_v58 = vand.u32 4294901760, %v1249_v33 }
 0x18c   :  { %v3912_v43 = vand.u32 4294901760, %v4080_v7  ;;  %v3513_v19 = vpack.c.bf16 %v1236_v37, %v1229_v29 }
 0x18e   :  { %v1340_v54 = vsub.f32 %v4080_v7, %v3912_v43  ;;  %v3919_v43 = vand.u32 4294901760, %v3382_v14 }
 0x190   :  { %v1341_v25 = vand.u32 4294901760, %v1340_v54  ;;  %v1354_v51 = vsub.f32 %v3382_v14, %v3919_v43  ;;  %v1361_v54 = vsub.f32 %v3384_v47, %v3921_v44  ;;  %v1243_v43 = vand.u32 4294901760, %v1242_v15 }
 0x191   :  { %v3927_v44 = vand.u32 4294901760, %v3392_v52  ;;  %v1263_v15 = vsub.f32 %v3396_v5, %v3929_v36 }
 0x192   :  { %v3508_v8 = vpack.c.bf16 %v1348_v34, %v1341_v25  ;;  %v1355_v4 = vand.u32 4294901760, %v1354_v51  ;;  %v1362_v63 = vand.u32 4294901760, %v1361_v54  ;;  %v3928_v25 = vand.u32 4294901760, %v3394_v53 }
 0x193   :  { %v1368_v51 = vsub.f32 %v3390_v6, %v3924_v32  ;;  %v1375_v37 = vsub.f32 %v3392_v52, %v3927_v44  ;;  %v3533_v54 = vpack.c.bf16 %v1250_v58, %v1243_v43  ;;  %v1264_v44 = vand.u32 4294901760, %v1263_v15 }
 0x194   :  { %v3521_v34 = vpack.c.bf16 %v1362_v63, %v1355_v4  ;;  %v1256_v29 = vsub.f32 %v3394_v53, %v3928_v25  ;;  %v3930_v4 = vand.u32 4294901760, %v3399_v9  ;;  %v3935_v63 = vand.u32 4294901760, %v3401_v49 }
 0x195   :  { %v1369_v33 = vand.u32 4294901760, %v1368_v51  ;;  %v1376_v32 = vand.u32 4294901760, %v1375_v37  ;;  %v3939_v43 = vand.u32 4294901760, %v3407_v62  ;;  %v1270_v51 = vsub.f32 %v3405_v12, %v3938_v57 }
 0x196   :  { %v1257_v18 = vand.u32 4294901760, %v1256_v29  ;;  %v1382_v25 = vsub.f32 %v3399_v9, %v3930_v4  ;;  %v1389_v58 = vsub.f32 %v3401_v49, %v3935_v63  ;;  %v3945_v63 = vand.u32 4294901760, %v3417_v35 }
 0x197   :  { %v3548_v36 = vpack.c.bf16 %v1376_v32, %v1369_v33  ;;  %v1277_v4 = vsub.f32 %v3407_v62, %v3939_v43  ;;  %v1271_v22 = vand.u32 4294901760, %v1270_v51  ;;  %v3947_v32 = vand.u32 4294901760, %v3419_v2 }
 0x198   :  { %v3553_v37 = vpack.c.bf16 %v1264_v44, %v1257_v18  ;;  %v1383_v29 = vand.u32 4294901760, %v1382_v25  ;;  %v1390_v15 = vand.u32 4294901760, %v1389_v58  ;;  %v3946_v57 = vand.u32 4294901760, %v3423_v48 }
 0x199   :  { %v1278_v10 = vand.u32 4294901760, %v1277_v4  ;;  %v1396_v44 = vsub.f32 %v3415_v31, %v3942_v61  ;;  %v1403_v18 = vsub.f32 %v3417_v35, %v3945_v63  ;;  %v1284_v25 = vsub.f32 %v3419_v2, %v3947_v32 }
 0x19a   :  { %v3561_v33 = vpack.c.bf16 %v1390_v15, %v1383_v29  ;;  %v1291_v4 = vsub.f32 %v3423_v48, %v3946_v57  ;;  %v2431_v63 = vpack.c.bf16 %v4073_v0, %v4070_v59 }
 0x19b   :  { %v3573_v58 = vpack.c.bf16 %v1278_v10, %v1271_v22  ;;  %v1397_v51 = vand.u32 4294901760, %v1396_v44  ;;  %v1404_v29 = vand.u32 4294901760, %v1403_v18  ;;  %v1285_v15 = vand.u32 4294901760, %v1284_v25 }
 0x19c   :  { %v1292_v43 = vand.u32 4294901760, %v1291_v4  ;;  %v4084_v18 = vlaneseq }
 0x19d   :  { %v2425_v38 = vpack.c.bf16 %v1404_v29, %v1397_v51 }
 0x19e   :  { %v2427_v61 = vpack.c.bf16 %v1292_v43, %v1285_v15  ;;  %v123_v43 = vpop.xlane.xlu0 %122  ;;  %v1018_v29 = vshrl.u32 %v4084_v18, 7  ;;  %v1015_v15 = vld [vmem:[%s3805_s3] sm:$0x3] }
 0x19f   :  { %v124_v51 = vmax.f32 %v123_v43, 1.0 }
 0x1a0   :  { %v1019_v44 = vsub.s32 0, %v1018_v29  ;;  %v1023_v57 = vsub.s32 1, %v1018_v29 }
 0x1a1   :  { %2593 = vrcp.f32 %v124_v51 }
 0x1a2   :  { %v1020_v22 = vrot.slane %v1015_v15, %v1019_v44  ;;  %v1024_v0 = vrot.slane %v1015_v15, %v1023_v57  ;;  %v4109_v15 = vld [vmem:[#allocation14_spill] sm:$0xff] }
 0x1ab   :  { %v2594_v10 = vpop.eup %2593 }
 0x250   :  { %v1008_v32 = vpop.f32.mrb[0].mxu0 }
 0x251   :  { %v1013_v59 = vmul.f32 %v2594_v10, %v1008_v32  ;;  %v1010_v25 = vpop.f32.mrb[1].mxu0  ;;  %v4102_v32 = vld [vmem:[#allocation37_spill] sm:$0xff] }
 0x252   :  { %v1014_v28 = vmul.f32 %v2594_v10, %v1010_v25  ;;  %v4105_v10 = vld [vmem:[#allocation45_spill] sm:$0xff]  ;;  %v4107_v25 = vld [vmem:[#allocation12_spill] sm:$0xff] }
 0x253   :  { %v1027_v27 = vadd.f32 %v1020_v22, %v1013_v59  ;;  %v4106_v22 = vld [vmem:[#allocation49_spill] sm:$0xff] }
 0x254   :  { %v1028_v4 = vadd.f32 %v1024_v0, %v1014_v28  ;;  %v4086_v0 = vpack.c.bf16 %v3200_v46, %v3198_v24 }
 0x255   :  { %v1029_v55 = vmax.f32 %v1027_v27, 0.0 }
 0x256   :  { %v1030_v43 = vmax.f32 %v1028_v4, 0.0  ;;  %v4108_v4 = vld [vmem:[#allocation13_spill] sm:$0xff] }
 0x257   :  { %v3614_v51 = vand.u32 4294901760, %v1029_v55 }
 0x258   :  { %v3616_v18 = vand.u32 4294901760, %v1030_v43 }
 0x259   :  { %v3619_v17 = vsub.f32 %v1029_v55, %v3614_v51  ;;  %v4085_v55 = vpack.c.bf16 %v4075_v42, %v4074_v20 }
 0x25a   :  { %v1167_v29 = vsub.f32 %v1030_v43, %v3616_v18  ;;  %v4110_v43 = vld [vmem:[#allocation15_spill] sm:$0xff] }
 0x25b   :  { %v1174_v44 = vand.u32 4294901760, %v3619_v17 }
 0x25c   :  { %v1168_v23 = vand.u32 4294901760, %v1167_v29 }
 0x25d   :  { %v1175_v57 = vsub.f32 %v3619_v17, %v1174_v44 }
 0x25e   :  { %v1169_v59 = vsub.f32 %v1167_v29, %v1168_v23 }
 0x25f   :  { %v1176_v27 = vand.u32 4294901760, %v1175_v57  ;;  %v4113_v57 = vld [vmem:[#allocation18_spill] sm:$0xff] }
 0x260   :  { %v1170_v28 = vand.u32 4294901760, %v1169_v59  ;;  %v4114_v59 = vld [vmem:[#allocation29_spill] sm:$0xff] }
 0x262   :  { %1171 = vmatprep.mubr.f32.mxu1 %v1170_v28  ;;  %v4115_v28 = vand.u32 4294901760, %v4114_v59  ;;  %v4127_v59 = vand.u32 4294901760, %v4076_v60 }
 0x263   :  { %1177 = vmatmul.mubr.f32.vlgmr.msra.gmra.mrb[0].mxu1 %v1176_v27  ;;  %v4116_v27 = vld [vmem:[#allocation30_spill] sm:$0xff] }
 0x264   :  { %2400 = vmatpush3.bf16.msra.mxu1 %v3462_v11  ;;  %1407 = vmatprep.mubr.f32.mxu1 %v3616_v18  ;;  %v4093_v11 = vpack.c.bf16 %v3392_v52, %v3390_v6 }
 0x265   :  { %2402 = vmatprep.subr.bf16.mxu1 %v3464_v50  ;;  %v4094_v50 = vpack.c.bf16 %v3396_v5, %v3394_v53 }
 0x268   :  { %2404 = vmatpush3.bf16.msra.mxu1 %v3470_v26  ;;  %v4095_v26 = vpack.c.bf16 %v3401_v49, %v3399_v9 }
 0x269   :  { %2406 = vmatprep.subr.bf16.mxu1 %v3485_v1  ;;  %v4092_v1 = vpack.c.bf16 %v3388_v40, %v3386_v39 }
 0x26c   :  { %2408 = vmatpush3.bf16.msra.mxu1 %v3498_v3  ;;  %v4096_v3 = vpack.c.bf16 %v3407_v62, %v3405_v12 }
 0x26d   :  { %2410 = vmatprep.subr.bf16.mxu1 %v3508_v8  ;;  %v4087_v8 = vpack.c.bf16 %v4077_v41, %v4076_v60  ;;  %v4134_v60 = vand.u32 4294901760, %v4083_v13 }
 0x270   :  { %2412 = vmatpush3.bf16.msra.mxu1 %v3513_v19  ;;  %v4097_v19 = vpack.c.bf16 %v3417_v35, %v3415_v31 }
 0x271   :  { %2414 = vmatprep.subr.bf16.mxu1 %v3521_v34  ;;  %v4098_v34 = vpack.c.bf16 %v3423_v48, %v3419_v2 }
 0x274   :  { %2416 = vmatpush3.bf16.msra.mxu1 %v3533_v54  ;;  %v4099_v54 = vld [vmem:[#allocation28_spill] sm:$0xff] }
 0x275   :  { %2418 = vmatprep.subr.bf16.mxu1 %v3548_v36  ;;  %v4091_v36 = vpack.c.bf16 %v3384_v47, %v3382_v14 }
 0x278   :  { %2420 = vmatpush3.bf16.msra.mxu1 %v3553_v37  ;;  %v4101_v37 = vld [vmem:[#allocation34_spill] sm:$0xff] }
 0x279   :  { %2422 = vmatprep.subr.bf16.mxu1 %v3561_v33  ;;  %v4103_v33 = vld [vmem:[#allocation39_spill] sm:$0xff] }
 0x27c   :  { %2424 = vmatpush3.bf16.msra.mxu1 %v3573_v58  ;;  %v4104_v58 = vld [vmem:[#allocation44_spill] sm:$0xff] }
 0x27d   :  { %2426 = vmatprep.subr.bf16.mxu1 %v2425_v38  ;;  %v4088_v38 = vpack.c.bf16 %v4079_v45, %v4078_v56 }
 0x280   :  { %2428 = vmatpush3.bf16.msra.mxu1 %v2427_v61  ;;  %v4090_v61 = vpack.c.bf16 %v4083_v13, %v4082_v30  ;;  %v4141_v13 = vand.u32 4294901760, %v3394_v53  ;;  %v4148_v53 = vand.u32 4294901760, %v3417_v35 }
 0x281   :  { %2430 = vmatprep.subr.bf16.mxu1 %v2429_v21  ;;  %v4089_v21 = vpack.c.bf16 %v4081_v16, %v4080_v7 }
 0x283   :  { %1409 = vmatmul.mubr.f32.vlgmr.msra.gmra.mrb[2].mxu1 %v3614_v51 }
 0x284   :  { %2432 = vmatpush3.bf16.msra.mxu1 %v2431_v63  ;;  %1544 = vmatprep.mubr.f32.mxu1 %v1167_v29  ;;  %v4100_v63 = vld [vmem:[#allocation32_spill] sm:$0xff]  ;;  %v4112_v29 = vld [vmem:[#allocation17_spill] sm:$0xff] }
 0x285   :  { %2434 = vmatprep.subr.bf16.mxu1 %v4085_v55  ;;  %v4117_v55 = vand.u32 4294901760, %v4116_v27  ;;  %v4131_v27 = vand.u32 4294901760, %v4080_v7  ;;  %v4138_v7 = vand.u32 4294901760, %v3388_v40  ;;  %v4145_v40 = vand.u32 4294901760, %v3405_v12 }
 0x288   :  { %2436 = vmatpush3.bf16.msra.mxu1 %v4086_v0  ;;  %v2493_v0 = vpack.c.bf16 %v4117_v55, %v4115_v28  ;;  %v4128_v28 = vand.u32 4294901760, %v4077_v41  ;;  %v4135_v41 = vand.u32 4294901760, %v3382_v14  ;;  %v4142_v14 = vand.u32 4294901760, %v3396_v5 }
 0x289   :  { %2438 = vmatprep.subr.bf16.mxu1 %v4087_v8  ;;  %v4118_v8 = vld [vmem:[#allocation19_spill] sm:$0xff]  ;;  %v4149_v5 = vand.u32 4294901760, %v3419_v2 }
 0x28c   :  { %2440 = vmatpush3.bf16.msra.mxu1 %v4088_v38  ;;  %v4119_v38 = vld [vmem:[#allocation31_spill] sm:$0xff] }
 0x28d   :  { %2442 = vmatprep.subr.bf16.mxu1 %v4089_v21  ;;  %v4120_v21 = vand.u32 4294901760, %v4119_v38 }
 0x290   :  { %2444 = vmatpush3.bf16.msra.mxu1 %v4090_v61  ;;  %v4121_v61 = vld [vmem:[#allocation33_spill] sm:$0xff] }
 0x291   :  { %2446 = vmatprep.subr.bf16.mxu1 %v4091_v36  ;;  %v4122_v36 = vand.u32 4294901760, %v4121_v61 }
 0x294   :  { %2448 = vmatpush3.bf16.msra.mxu1 %v4092_v1  ;;  %v2495_v1 = vpack.c.bf16 %v4122_v36, %v4120_v21  ;;  %v2515_v36 = vpack.c.bf16 %v4142_v14, %v4141_v13 }
 0x295   :  { %2450 = vmatprep.subr.bf16.mxu1 %v4093_v11  ;;  %v4123_v11 = vand.u32 4294901760, %v4074_v20  ;;  %v2501_v20 = vpack.c.bf16 %v4128_v28, %v4127_v59 }
 0x298   :  { %2452 = vmatpush3.bf16.msra.mxu1 %v4094_v50  ;;  %v4124_v50 = vand.u32 4294901760, %v4075_v42  ;;  %v4129_v42 = vand.u32 4294901760, %v4078_v56  ;;  %v4136_v56 = vand.u32 4294901760, %v3384_v47  ;;  %v4143_v47 = vand.u32 4294901760, %v3399_v9 }
 0x299   :  { %2454 = vmatprep.subr.bf16.mxu1 %v4095_v26  ;;  %v4150_v9 = vand.u32 4294901760, %v3423_v48 }
 0x29a   :  { %v2497_v26 = vpack.c.bf16 %v4124_v50, %v4123_v11  ;;  %v2509_v38 = vpack.c.bf16 %v4136_v56, %v4135_v41 }
 0x29c   :  { %2456 = vmatpush3.bf16.msra.mxu1 %v4096_v3  ;;  %v4125_v3 = vand.u32 4294901760, %v3198_v24  ;;  %v4132_v24 = vand.u32 4294901760, %v4081_v16  ;;  %v4139_v16 = vand.u32 4294901760, %v3390_v6  ;;  %v4146_v6 = vand.u32 4294901760, %v3407_v62 }
 0x29d   :  { %2458 = vmatprep.subr.bf16.mxu1 %v4097_v19  ;;  %v4126_v19 = vand.u32 4294901760, %v3200_v46  ;;  %v4133_v46 = vand.u32 4294901760, %v4082_v30  ;;  %v4140_v30 = vand.u32 4294901760, %v3392_v52  ;;  %v4147_v52 = vand.u32 4294901760, %v3415_v31  ;;  %v1962_v31 = vld [vmem:[%s3807_s5] ss:$0 sm:$0xff] }
 0x29e   :  { %v2505_v55 = vpack.c.bf16 %v4132_v24, %v4131_v27  ;;  %v2519_v11 = vpack.c.bf16 %v4146_v6, %v4145_v40  ;;  %s2709_s5 = smov [#allocation8]  }
 0x29f   :  { %v2513_v61 = vpack.c.bf16 %v4140_v30, %v4139_v16  ;;  %v2521_v50 = vpack.c.bf16 %v4148_v53, %v4147_v52  ;;  %s1951_s14 = sshll.u32 %s2709_s5, 4  ;;  %s1952_s14 = int_to_ptr.vmem [resolvable:$true] %s1951_s14 }
 0x2a0   :  { %2460 = vmatpush3.bf16.msra.mxu1 %v4098_v34  ;;  %v2499_v34 = vpack.c.bf16 %v4126_v19, %v4125_v3  ;;  %s2665_s15 = scalar_lea.vmem %s1952_s14, 128  ;;  %p2670_p11 = scmp.lt.s32.totalorder %s1952_s14, %s1952_s14 }
 0x2a1   :  { %2462 = vmatprep.subr.bf16.mxu1 %v4099_v54  ;;  %p2666_p10 = scmp.ne.s32.totalorder %s1952_s14, %s2665_s15  ;;  %p2671_p12 = scmp.lt.s32.totalorder %s2665_s15, %s2665_s15 }
 0x2a3   :  { %1547 = vmatmul.mubr.f32.vlgmr.msra.gmra.mrb[4].mxu1 %v3619_v17  ;;  %v4130_v17 = vand.u32 4294901760, %v4079_v45  ;;  %v4137_v45 = vand.u32 4294901760, %v3386_v39  ;;  %v4144_v39 = vand.u32 4294901760, %v3401_v49  ;;  %p2672_p13 = por %p2671_p12, %p2670_p11 }
 0x2a4   :  { %2464 = vmatpush3.bf16.msra.mxu1 %v4100_v63  ;;  %1651 = vmatprep.mubr.f32.mxu1 %v1168_v23  ;;  %v4111_v23 = vld [vmem:[#allocation16_spill] sm:$0xff] }
 0x2a5   :  { %2466 = vmatprep.subr.bf16.mxu1 %v4101_v37  ;;  %v2511_v21 = vpack.c.bf16 %v4138_v7, %v4137_v45  ;;  %p2673_p0 = pnand %p2672_p13, %p2666_p10 }
 0x2a8   :  { %2468 = vmatpush3.bf16.msra.mxu1 %v4102_v32 }
 0x2a9   :  { %2470 = vmatprep.subr.bf16.mxu1 %v4103_v33 }
 0x2ac   :  { %2472 = vmatpush3.bf16.msra.mxu1 %v4104_v58 }
 0x2ad   :  { %2474 = vmatprep.subr.bf16.mxu1 %v4105_v10 }
 0x2b0   :  { %2476 = vmatpush3.bf16.msra.mxu1 %v4106_v22 }
 0x2b1   :  { %2478 = vmatprep.subr.bf16.mxu1 %v4107_v25 }
 0x2b4   :  { %2480 = vmatpush3.bf16.msra.mxu1 %v4108_v4 }
 0x2b5   :  { %2482 = vmatprep.subr.bf16.mxu1 %v4109_v15 }
 0x2b8   :  { %2484 = vmatpush3.bf16.msra.mxu1 %v4110_v43 }
 0x2b9   :  { %2486 = vmatprep.subr.bf16.mxu1 %v4111_v23 }
 0x2bc   :  { %2488 = vmatpush3.bf16.msra.mxu1 %v4112_v29 }
 0x2bd   :  { %2490 = vmatprep.subr.bf16.mxu1 %v4113_v57 }
 0x2c0   :  { %2492 = vmatpush3.bf16.msra.mxu1 %v4118_v8 }
 0x2c1   :  { %2494 = vmatprep.subr.bf16.mxu1 %v2493_v0  ;;  %v2507_v0 = vpack.c.bf16 %v4134_v60, %v4133_v46 }
 0x2c3   :  { %1655 = vmatmul.mubr.f32.vlgmr.msra.gmra.mrb[6].mxu1 %v1174_v44  ;;  %v2503_v44 = vpack.c.bf16 %v4130_v17, %v4129_v42 }
 0x2c4   :  { %2496 = vmatpush3.bf16.msra.mxu1 %v2495_v1  ;;  %1821 = vmatprep.mubr.f32.mxu1 %v3616_v18  ;;  %v2517_v1 = vpack.c.bf16 %v4144_v39, %v4143_v47 }
 0x2c5   :  { %2498 = vmatprep.subr.bf16.mxu1 %v2497_v26  ;;  %v2523_v26 = vpack.c.bf16 %v4150_v9, %v4149_v5 }
 0x2c8   :  { %2500 = vmatpush3.bf16.msra.mxu1 %v2499_v34 }
 0x2c9   :  { %2502 = vmatprep.subr.bf16.mxu1 %v2501_v20 }
 0x2cc   :  { %2504 = vmatpush3.bf16.msra.mxu1 %v2503_v44 }
 0x2cd   :  { %2506 = vmatprep.subr.bf16.mxu1 %v2505_v55 }
 0x2d0   :  { %2508 = vmatpush3.bf16.msra.mxu1 %v2507_v0 }
 0x2d1   :  { %2510 = vmatprep.subr.bf16.mxu1 %v2509_v38 }
 0x2d4   :  { %2512 = vmatpush3.bf16.msra.mxu1 %v2511_v21 }
 0x2d5   :  { %2514 = vmatprep.subr.bf16.mxu1 %v2513_v61 }
 0x2d8   :  { %2516 = vmatpush3.bf16.msra.mxu1 %v2515_v36 }
 0x2d9   :  { %2518 = vmatprep.subr.bf16.mxu1 %v2517_v1 }
 0x2dc   :  { %2520 = vmatpush3.bf16.msra.mxu1 %v2519_v11 }
 0x2dd   :  { %2522 = vmatprep.subr.bf16.mxu1 %v2521_v50 }
 0x2e0   :  { %2524 = vmatpush3.bf16.msra.mxu1 %v2523_v26 }
 0x2e1   :  { %2526 = vmatprep.subr.bf16.mxu1 %v4099_v54 }
 0x2e3   :  { %1823 = vmatmul.mubr.f32.vlgmr.msra.gmra.mrb[8].mxu1 %v3614_v51 }
 0x2e4   :  { %2528 = vmatpush3.bf16.msra.mxu1 %v4100_v63  ;;  %1925 = vmatprep.mubr.f32.mxu1 %v3616_v18 }
 0x2e5   :  { %2530 = vmatprep.subr.bf16.mxu1 %v4101_v37 }
 0x2e8   :  { %2532 = vmatpush3.bf16.msra.mxu1 %v4102_v32 }
 0x2e9   :  { %2534 = vmatprep.subr.bf16.mxu1 %v4103_v33 }
 0x2ec   :  { %2536 = vmatpush3.bf16.msra.mxu1 %v4104_v58 }
 0x2ed   :  { %2538 = vmatprep.subr.bf16.mxu1 %v4105_v10 }
 0x2f0   :  { %2540 = vmatpush3.bf16.msra.mxu1 %v4106_v22 }
 0x2f1   :  { %2542 = vmatprep.subr.bf16.mxu1 %v4107_v25 }
 0x2f4   :  { %2544 = vmatpush3.bf16.msra.mxu1 %v4108_v4 }
 0x2f5   :  { %2546 = vmatprep.subr.bf16.mxu1 %v4109_v15 }
 0x2f8   :  { %2548 = vmatpush3.bf16.msra.mxu1 %v4110_v43 }
 0x2f9   :  { %2550 = vmatprep.subr.bf16.mxu1 %v4111_v23 }
 0x2fc   :  { %2552 = vmatpush3.bf16.msra.mxu1 %v4112_v29 }
 0x2fd   :  { %2554 = vmatprep.subr.bf16.mxu1 %v4113_v57 }
 0x300   :  { %2556 = vmatpush3.bf16.msra.mxu1 %v4118_v8  ;;  %v4151_v8 = vld [vmem:[#allocation27_spill] sm:$0xff] }
 0x301   :  { %vm1932_vm8 = vcmp.lt.s32.totalorder %v4151_v8, 5 }
 0x303   :  { %1927 = vmatmul.mubr.f32.vlgmr.msra.gmra.mrb[10].mxu1 %v3614_v51 }
 0x336   :  { %v1995_v49 = vpop.f32.mrb[0].mxu1 }
 0x337   :  { %v1996_v12 = vpop.f32.mrb[1].mxu1 }
 0x338   :  { %v1997_v62 = vadd.f32 %v1996_v12, %v1995_v49 }
 0x33a   :  { %v1179_v48 = vadd.f32 %v1997_v62, %v1962_v31 }
 0x356   :  { %v2030_v35 = vpop.f32.mrb[2].mxu1 }
 0x357   :  { %v2031_v2 = vpop.f32.mrb[3].mxu1 }
 0x358   :  { %v2032_v18 = vadd.f32 %v2031_v2, %v2030_v35 }
 0x35a   :  { %v1411_v54 = vadd.f32 %v2032_v18, %v1179_v48 }
 0x376   :  { %v2065_v63 = vpop.f32.mrb[4].mxu1 }
 0x377   :  { %v2066_v37 = vpop.f32.mrb[5].mxu1 }
 0x378   :  { %v2067_v32 = vadd.f32 %v2066_v37, %v2065_v63 }
 0x37a   :  { %v1549_v33 = vadd.f32 %v2067_v32, %v1411_v54 }
 0x396   :  { %v2100_v58 = vpop.f32.mrb[6].mxu1 }
 0x397   :  { %v2101_v10 = vpop.f32.mrb[7].mxu1 }
 0x398   :  { %v2102_v22 = vadd.f32 %v2101_v10, %v2100_v58 }
 0x39a   :  { %v1657_v51 = vadd.f32 %v2102_v22, %v1549_v33 }
 0x3b6   :  { %v2135_v25 = vpop.f32.mrb[8].mxu1 }
 0x3b7   :  { %v2136_v4 = vpop.f32.mrb[9].mxu1 }
 0x3b8   :  { %v2137_v15 = vadd.f32 %v2136_v4, %v2135_v25 }
 0x3ba   :  { %v1825_v43 = vadd.f32 %v2137_v15, %v1657_v51 }
 0x3d6   :  { %v2170_v23 = vpop.f32.mrb[10].mxu1 }
 0x3d7   :  { %v2171_v29 = vpop.f32.mrb[11].mxu1 }
 0x3d8   :  { %v2172_v57 = vadd.f32 %v2171_v29, %v2170_v23 }
 0x3da   :  { %v1929_v3 = vadd.f32 %v2172_v57, %v1825_v43 }
 0x3dc   :  { %v1933_v19 = vsel %vm1932_vm8, %v1929_v3, -1e+30 }
 0x3dd   :  { %1934 = vmax.xlane.f32.xlu1 %v1933_v19 }
 0x46a   :  { %v1935_v34 = vpop.xlane.xlu1 %1934 }
 0x46b   :  { %v1936_v59 = vsub.f32 %v1933_v19, %v1935_v34 }
 0x46d   :  { %v1937_v28 = vmul.f32 1.442695, %v1936_v59 }
 0x46f   :  { %2595 = vpow2.f32 %v1937_v28 }
 0x479   :  { %v2596_v20 = vpop.eup %2595 }
 0x47a   :  { %1939 = vadd.xlane.f32.xlu0 %v2596_v20 }
 0x507   :  { %v1940_v42 = vpop.xlane.xlu0 %1939 }
 0x508   :  { %2597 = vlog2.f32 %v1940_v42 }
 0x512   :  { %v2598_v17 = vpop.eup %2597 }
 0x513   :  { %v1942_v44 = vmul.f32 0.6931472, %v2598_v17 }
 0x515   :  { %v1943_v27 = vsub.f32 %v1936_v59, %v1942_v44 }
 0x517   :  { %1944 = vst [vmem:[#allocation8] sm:$0xff] %v1943_v27 }
 0x518   :  { %2676 = shalt.err (!%p2673_p0)
}
 0x519   :  { %s2677_s18 = scalar_lea.hbm %s3808_s6, 128 }
 0x51a   :  { %p2678_p1 = scmp.ne.s32.totalorder %s3808_s6, %s2677_s18  ;;  %p2681_p2 = scmp.lt.u32.totalorder %s2677_s18, %s3808_s6 }
 0x51c   :  { %p2683_p3 = pnand %p2681_p2, %p2678_p1 }
 0x51e   :  { %2686 = shalt.err (!%p2683_p3)
}
 0x51f   :  { %1954 = dma.vmem_to_hbm [thread:$0]  %s1952_s14, 128, %s3808_s6, [#allocation4]  }
 0x520   :  { %2691 = dma.done.wait [#allocation4], 128  }
 0x521   :  { %2692 = vsyncadd [#allocation4], 4294967168 }
 0x522   :  { %1958 = vsyncpa [#allocation3], 1 }
 0x523   :  { %1959 = vsyncpa [#allocation6], 1 }
 0x524   :  { %1960 = vsyncpa [#allocation4], 1 }

</bundles_post_ra>
